<compile_context>
chip_gen: v7x
topology: tpu7x:2x2x1
jax: 0.10.0
libtpu: 0.0.40
codegen_flags: <defaults>
</compile_context>

<pallas_src>
import math
import functools

import jax
import jax.numpy as jnp
from jax.experimental import pallas as pl
from jax.experimental.pallas import tpu as pltpu


# Fixed network geometry (seq_len = 60, conv k=5 stride=2, pool 2/2).
SEQ_LEN = 60
C_IN_PAD = 10           # lx / rx (3 input channels) are zero-padded up to 10
C1, C1_PAD = 64, 128    # conv1 out channels, padded to a full lane tile
C2 = 128                # conv2 out channels (already lane dense)
H1, H1_PAD = 168, 256   # linear1
H2, H2_PAD = 60, 128    # linear2
H3, H3_PAD = 32, 128    # linear3
T1 = 14                 # time steps after conv1 + pool
NUM_BRANCHES = 4

# (phase k, shift s) pairs of the pre-sliced conv1 inputs; slice i holds
# x[b, :, 4*p + 4*s + k] for p = 0..13, with batch folded into the rows.
_PHASE_SLICES = [(0, 0), (1, 0), (2, 0), (3, 0), (0, 1), (1, 1), (2, 1)]


# --------------------------------------------------------------------------------------
# Pallas kernel: one branch per grid step, everything fused.
# --------------------------------------------------------------------------------------
def fused_net_kernel(xs_ref, w1_ref, cb1_ref, bn1s_ref, bn1b_ref,
                     w2_ref, cb2_ref, bn2s_ref, bn2b_ref,
                     w1a_ref, w1b_ref, bl1_ref,
                     wl2_ref, bl2_ref, wl3_ref, bl3_ref,
                     o_ref):
    """Shapes (per branch block, leading branch dim = 1):

    xs_ref : (1, 7, B*14, 10)   conv1 phase/shift input slices (batch in rows)
    w1_ref : (1, 5, 10, 128)    conv1 taps, (C_in, C_out_padded)
    w2_ref : (1, 5, 128, 128)   conv2 taps
    cb*/bn*/bl* : (1, 1, lanes) biases / folded eval-BN scale+shift
    w1a/w1b : (1, 128, 256)     linear1 split by flatten time index (t=0 / t=1)
    wl2 : (1, 256, 128), wl3 : (1, 128, 128)
    o_ref : (1, B, 128)         padded MLP output (first 32 lanes are real)
    """
    B = o_ref.shape[1]

    def mm(a, b):
        return jnp.dot(a, b, preferred_element_type=jnp.float32)

    # ---- stage 1: Conv1d(k=5, s=2) + ReLU + MaxPool(2,2) + BN(eval) ----
    # "even" rows = conv output at t=2p, "odd" rows = t=2p+1; the max-pool of the
    # pair is one whole-tile maximum.  Batch is folded into M (= B*14).
    even = mm(xs_ref[0, 0], w1_ref[0, 0])
    for j in range(1, 5):
        even = even + mm(xs_ref[0, j], w1_ref[0, j])
    odd = mm(xs_ref[0, 2], w1_ref[0, 0])
    for j in range(1, 5):
        odd = odd + mm(xs_ref[0, 2 + j], w1_ref[0, j])
    pooled = jnp.maximum(jnp.maximum(even, odd) + cb1_ref[0], 0.0)   # (B*14, 128)
    h1 = pooled * bn1s_ref[0] + bn1b_ref[0]                          # (B*14, 128)

    # ---- stage 2 + MLP, per batch element (tiny: B static, full-tile ops) ----
    # Conv2 is computed as a stride-1 conv over 7 positions (static contiguous
    # slices of h1); the stride-2 conv + MaxPool(2,2) then only needs static
    # rows {0,2} and {4,6} (the PyTorch pool drops the 5th conv output).
    for b in range(B):
        base = b * T1
        y2 = mm(h1[base + 0:base + 7, :], w2_ref[0, 0])
        for j in range(1, 5):
            y2 = y2 + mm(h1[base + j:base + j + 7, :], w2_ref[0, j])
        z = jnp.maximum(y2 + cb2_ref[0], 0.0)                        # (7, 128)
        r0 = jnp.maximum(z[0:1, :], z[2:3, :]) * bn2s_ref[0] + bn2b_ref[0]  # (1,128), time 0
        r1 = jnp.maximum(z[4:5, :], z[6:7, :]) * bn2s_ref[0] + bn2b_ref[0]  # (1,128), time 1

        # Flatten (channel-major) is folded into linear1's column split.
        h = jnp.maximum(mm(r0, w1a_ref[0]) + mm(r1, w1b_ref[0]) + bl1_ref[0], 0.0)
        h = jnp.maximum(mm(h, wl2_ref[0]) + bl2_ref[0], 0.0)
        h = jnp.maximum(mm(h, wl3_ref[0]) + bl3_ref[0], 0.0)         # (1, 128)
        o_ref[0, b, :] = h[0, :]


# --------------------------------------------------------------------------------------
# Wrapper: input phase-split + one pallas_call for the whole network.
# --------------------------------------------------------------------------------------
def _branch_spec(shape):
    rank = len(shape)
    zeros = (0,) * (rank - 1)
    return pl.BlockSpec((1,) + tuple(shape[1:]), lambda br, _z=zeros: (br,) + _z)


def timeseries_net_light(l, lx, r, rx, packed):
    """l, r: (B, 10, 60); lx, rx: (B, 3, 60). Returns 4 tensors of shape (B, 32)."""
    B = l.shape[0]

    def prep(x):
        pad = C_IN_PAD - x.shape[1]
        if pad:
            x = jnp.pad(x, ((0, 0), (0, pad), (0, 0)))
        return x

    # (branch, B, C, L) -> time-phase split: xp[br, b, k, i, c] = x[br, b, c, 4i + k]
    x = jnp.stack([prep(l), prep(lx), prep(r), prep(rx)], axis=0)     # (4, B, 10, 60)
    x = jnp.transpose(x, (0, 1, 3, 2))                                # (4, B, 60, 10)
    xp = x.reshape(NUM_BRANCHES, B, SEQ_LEN // 4, 4, C_IN_PAD)
    xp = jnp.transpose(xp, (0, 1, 3, 2, 4))                           # (4, B, 4, 15, 10)
    xs = jnp.stack([xp[:, :, k, s:s + T1, :] for (k, s) in _PHASE_SLICES], axis=1)
    xs = xs.reshape(NUM_BRANCHES, len(_PHASE_SLICES), B * T1, C_IN_PAD)

    inputs = [xs] + list(packed)
    in_specs = [_branch_spec(a.shape) for a in inputs]

    out = pl.pallas_call(
        fused_net_kernel,
        out_shape=jax.ShapeDtypeStruct((NUM_BRANCHES, B, H3_PAD), jnp.float32),
        grid=(NUM_BRANCHES,),
        in_specs=in_specs,
        out_specs=pl.BlockSpec((1, B, H3_PAD), lambda br: (br, 0, 0)),
        compiler_params=pltpu.CompilerParams(dimension_semantics=("parallel",)),
    )(*inputs)

    out = out[:, :, :H3]                                              # drop lane padding
    return out[0], out[1], out[2], out[3]


# --------------------------------------------------------------------------------------
# Parameter construction (matches the torch initialize_weights scheme) + packing.
# --------------------------------------------------------------------------------------
def _kaiming_uniform(key, shape):           # shape = (C_out, C_in, k); a=0 -> gain=sqrt(2)
    fan_in = shape[1] * shape[2]
    bound = math.sqrt(2.0) * math.sqrt(3.0 / fan_in)
    return jax.random.uniform(key, shape, jnp.float32, -bound, bound)


def _xavier_normal(key, shape):             # shape = (out, in), torch convention
    std = math.sqrt(2.0 / (shape[0] + shape[1]))
    return std * jax.random.normal(key, shape, jnp.float32)


def make_branch_params(key, c_in):
    k = jax.random.split(key, 5)
    eps = 1e-5
    # BatchNorm1d eval defaults: gamma=1, beta=0, running_mean=0, running_var=1.
    bn_scale = lambda n: jnp.full((n,), 1.0 / math.sqrt(1.0 + eps), jnp.float32)
    return {
        "conv1_w": _kaiming_uniform(k[0], (C1, c_in, 5)),
        "conv1_b": jnp.zeros((C1,), jnp.float32),
        "conv2_w": _kaiming_uniform(k[1], (C2, C1, 5)),
        "conv2_b": jnp.zeros((C2,), jnp.float32),
        "bn1_scale": bn_scale(C1), "bn1_shift": jnp.zeros((C1,), jnp.float32),
        "bn2_scale": bn_scale(C2), "bn2_shift": jnp.zeros((C2,), jnp.float32),
        "lin1_w": _xavier_normal(k[2], (H1, 2 * C2)), "lin1_b": jnp.zeros((H1,), jnp.float32),
        "lin2_w": _xavier_normal(k[3], (H2, H1)), "lin2_b": jnp.zeros((H2,), jnp.float32),
        "lin3_w": _xavier_normal(k[4], (H3, H2)), "lin3_b": jnp.zeros((H3,), jnp.float32),
    }


def _pack_branch(p):
    c_in = p["conv1_w"].shape[1]
    w1 = jnp.transpose(p["conv1_w"], (2, 1, 0))                       # (5, c_in, 64)
    w1 = jnp.pad(w1, ((0, 0), (0, C_IN_PAD - c_in), (0, C1_PAD - C1)))
    cb1 = jnp.pad(p["conv1_b"], (0, C1_PAD - C1)).reshape(1, C1_PAD)
    bn1s = jnp.pad(p["bn1_scale"], (0, C1_PAD - C1)).reshape(1, C1_PAD)
    bn1b = jnp.pad(p["bn1_shift"], (0, C1_PAD - C1)).reshape(1, C1_PAD)

    w2 = jnp.transpose(p["conv2_w"], (2, 1, 0))                       # (5, 64, 128)
    w2 = jnp.pad(w2, ((0, 0), (0, C1_PAD - C1), (0, 0)))
    cb2 = p["conv2_b"].reshape(1, C2)
    bn2s = p["bn2_scale"].reshape(1, C2)
    bn2b = p["bn2_shift"].reshape(1, C2)

    # nn.Flatten on (B, 128, 2) orders columns as c*2 + t; split linear1 into
    # the t=0 / t=1 column groups so no flatten/transpose is needed in-kernel.
    l1 = p["lin1_w"]                                                  # (168, 256)
    w1a = jnp.pad(jnp.transpose(l1[:, 0::2]), ((0, 0), (0, H1_PAD - H1)))   # (128, 256)
    w1b = jnp.pad(jnp.transpose(l1[:, 1::2]), ((0, 0), (0, H1_PAD - H1)))
    bl1 = jnp.pad(p["lin1_b"], (0, H1_PAD - H1)).reshape(1, H1_PAD)
    wl2 = jnp.pad(jnp.transpose(p["lin2_w"]), ((0, H1_PAD - H1), (0, H2_PAD - H2)))  # (256, 128)
    bl2 = jnp.pad(p["lin2_b"], (0, H2_PAD - H2)).reshape(1, H2_PAD)
    wl3 = jnp.pad(jnp.transpose(p["lin3_w"]), ((0, H2_PAD - H2), (0, H3_PAD - H3)))  # (128, 128)
    bl3 = jnp.pad(p["lin3_b"], (0, H3_PAD - H3)).reshape(1, H3_PAD)
    return [w1, cb1, bn1s, bn1b, w2, cb2, bn2s, bn2b, w1a, w1b, bl1, wl2, bl2, wl3, bl3]


def pack_params(branch_params):
    """Stack per-branch packed params along a leading branch axis."""
    cols = zip(*[_pack_branch(p) for p in branch_params])
    return [jnp.stack(c, axis=0) for c in cols]


# --------------------------------------------------------------------------------------
# Pure-JAX reference (high precision) for correctness checking.
# --------------------------------------------------------------------------------------
def _reference_branch(x, p):
    hp = jax.lax.Precision.HIGHEST

    def conv(x, w, b):
        y = jax.lax.conv_general_dilated(
            x, w, window_strides=(2,), padding="VALID",
            dimension_numbers=("NCH", "OIH", "NCH"), precision=hp)
        return y + b[None, :, None]

    def pool_bn(h, scale, shift):
        Bn, C, L = h.shape
        h = jnp.max(h[:, :, :(L // 2) * 2].reshape(Bn, C, L // 2, 2), axis=-1)
        return h * scale[None, :, None] + shift[None, :, None]

    h = pool_bn(jax.nn.relu(conv(x, p["conv1_w"], p["conv1_b"])), p["bn1_scale"], p["bn1_shift"])
    h = pool_bn(jax.nn.relu(conv(h, p["conv2_w"], p["conv2_b"])), p["bn2_scale"], p["bn2_shift"])
    h = h.reshape(h.shape[0], -1)
    h = jax.nn.relu(jnp.dot(h, p["lin1_w"].T, precision=hp) + p["lin1_b"])
    h = jax.nn.relu(jnp.dot(h, p["lin2_w"].T, precision=hp) + p["lin2_b"])
    h = jax.nn.relu(jnp.dot(h, p["lin3_w"].T, precision=hp) + p["lin3_b"])
    return h


# --------------------------------------------------------------------------------------
if __name__ == "__main__":
    key = jax.random.PRNGKey(0)
    k_inp, k_par = jax.random.split(key)
    ki = jax.random.split(k_inp, 4)
    kp = jax.random.split(k_par, 4)

    B = 2
    l = jax.random.normal(ki[0], (B, 10, SEQ_LEN), jnp.float32)
    lx = jax.random.normal(ki[1], (B, 3, SEQ_LEN), jnp.float32)
    r = jax.random.normal(ki[2], (B, 10, SEQ_LEN), jnp.float32)
    rx = jax.random.normal(ki[3], (B, 3, SEQ_LEN), jnp.float32)

    branch_params = [
        make_branch_params(kp[0], 10),   # l   (stage_*_conv, linear*)
        make_branch_params(kp[1], 3),    # lx  (stage_*_conv_x, linear*_x)
        make_branch_params(kp[2], 10),   # r   (stage_*_conv_2, linear*_2)
        make_branch_params(kp[3], 3),    # rx  (stage_*_conv_x2, linear*_x2)
    ]
    packed = pack_params(branch_params)

    fwd = jax.jit(functools.partial(timeseries_net_light, packed=packed))
    outs = jax.block_until_ready(fwd(l, lx, r, rx))

    refs = [_reference_branch(x, p) for x, p in zip((l, lx, r, rx), branch_params)]

    assert len(outs) == 4
    for o, ref in zip(outs, refs):
        assert o.shape == (B, H3) and o.dtype == jnp.float32
        assert bool(jnp.all(jnp.isfinite(o)))
        # Loose tolerance: kernel matmuls run at default (MXU) precision while the
        # reference runs at HIGHEST; structural errors would be O(1).
        assert float(jnp.max(jnp.abs(o - ref))) < 1e-1, float(jnp.max(jnp.abs(o - ref)))
    print("KERNEL_OK")
</pallas_src>

<mosaic_0001>
module attributes {stable_mosaic.version = 11 : i64} {
  func.func @fused_net_kernel(%arg0: i32, %arg1: memref<1x7x28x10xf32, #tpu.memory_space<vmem>>, %arg2: memref<1x5x10x128xf32, #tpu.memory_space<vmem>>, %arg3: memref<1x1x128xf32, #tpu.memory_space<vmem>>, %arg4: memref<1x1x128xf32, #tpu.memory_space<vmem>>, %arg5: memref<1x1x128xf32, #tpu.memory_space<vmem>>, %arg6: memref<1x5x128x128xf32, #tpu.memory_space<vmem>>, %arg7: memref<1x1x128xf32, #tpu.memory_space<vmem>>, %arg8: memref<1x1x128xf32, #tpu.memory_space<vmem>>, %arg9: memref<1x1x128xf32, #tpu.memory_space<vmem>>, %arg10: memref<1x128x256xf32, #tpu.memory_space<vmem>>, %arg11: memref<1x128x256xf32, #tpu.memory_space<vmem>>, %arg12: memref<1x1x256xf32, #tpu.memory_space<vmem>>, %arg13: memref<1x256x128xf32, #tpu.memory_space<vmem>>, %arg14: memref<1x1x128xf32, #tpu.memory_space<vmem>>, %arg15: memref<1x128x128xf32, #tpu.memory_space<vmem>>, %arg16: memref<1x1x128xf32, #tpu.memory_space<vmem>>, %arg17: memref<1x2x128xf32, #tpu.memory_space<vmem>>) attributes {dimension_semantics = [#tpu.dimension_semantics<parallel>], iteration_bounds = array<i64: 4>, scalar_prefetch = 0 : i64, scratch_operands = 0 : i64, tpu.core_type = #tpu.core_type<tc>, window_params = [{transform_indices = @transform_0, window_bounds = array<i64: 1, 7, 28, 10>}, {transform_indices = @transform_1, window_bounds = array<i64: 1, 5, 10, 128>}, {transform_indices = @transform_2, window_bounds = array<i64: 1, 1, 128>}, {transform_indices = @transform_3, window_bounds = array<i64: 1, 1, 128>}, {transform_indices = @transform_4, window_bounds = array<i64: 1, 1, 128>}, {transform_indices = @transform_5, window_bounds = array<i64: 1, 5, 128, 128>}, {transform_indices = @transform_6, window_bounds = array<i64: 1, 1, 128>}, {transform_indices = @transform_7, window_bounds = array<i64: 1, 1, 128>}, {transform_indices = @transform_8, window_bounds = array<i64: 1, 1, 128>}, {transform_indices = @transform_9, window_bounds = array<i64: 1, 128, 256>}, {transform_indices = @transform_10, window_bounds = array<i64: 1, 128, 256>}, {transform_indices = @transform_11, window_bounds = array<i64: 1, 1, 256>}, {transform_indices = @transform_12, window_bounds = array<i64: 1, 256, 128>}, {transform_indices = @transform_13, window_bounds = array<i64: 1, 1, 128>}, {transform_indices = @transform_14, window_bounds = array<i64: 1, 128, 128>}, {transform_indices = @transform_15, window_bounds = array<i64: 1, 1, 128>}, {transform_indices = @transform_16, window_bounds = array<i64: 1, 2, 128>}]} {
    %c0 = arith.constant 0 : index
    %c0_0 = arith.constant 0 : index
    %c0_1 = arith.constant 0 : index
    %c0_2 = arith.constant 0 : index
    %0 = vector.load %arg1[%c0, %c0_0, %c0_1, %c0_2] : memref<1x7x28x10xf32, #tpu.memory_space<vmem>>, vector<1x1x28x10xf32>
    %1 = vector.shape_cast %0 : vector<1x1x28x10xf32> to vector<28x10xf32>
    %c0_3 = arith.constant 0 : index
    %c0_4 = arith.constant 0 : index
    %c0_5 = arith.constant 0 : index
    %c0_6 = arith.constant 0 : index
    %2 = vector.load %arg2[%c0_3, %c0_4, %c0_5, %c0_6] : memref<1x5x10x128xf32, #tpu.memory_space<vmem>>, vector<1x1x10x128xf32>
    %3 = vector.shape_cast %2 : vector<1x1x10x128xf32> to vector<10x128xf32>
    %cst = arith.constant dense<0.000000e+00> : vector<28x128xf32>
    %4 = tpu.matmul %1, %3, %cst {dimension_numbers = #tpu.dot_dimension_numbers<[1], [0], [0], [1], [0, 0, 1, 1], [], []>} : vector<28x10xf32>, vector<10x128xf32>, vector<28x128xf32> -> vector<28x128xf32>
    %c0_7 = arith.constant 0 : index
    %c1 = arith.constant 1 : index
    %c0_8 = arith.constant 0 : index
    %c0_9 = arith.constant 0 : index
    %5 = vector.load %arg1[%c0_7, %c1, %c0_8, %c0_9] : memref<1x7x28x10xf32, #tpu.memory_space<vmem>>, vector<1x1x28x10xf32>
    %6 = vector.shape_cast %5 : vector<1x1x28x10xf32> to vector<28x10xf32>
    %c0_10 = arith.constant 0 : index
    %c1_11 = arith.constant 1 : index
    %c0_12 = arith.constant 0 : index
    %c0_13 = arith.constant 0 : index
    %7 = vector.load %arg2[%c0_10, %c1_11, %c0_12, %c0_13] : memref<1x5x10x128xf32, #tpu.memory_space<vmem>>, vector<1x1x10x128xf32>
    %8 = vector.shape_cast %7 : vector<1x1x10x128xf32> to vector<10x128xf32>
    %cst_14 = arith.constant dense<0.000000e+00> : vector<28x128xf32>
    %9 = tpu.matmul %6, %8, %cst_14 {dimension_numbers = #tpu.dot_dimension_numbers<[1], [0], [0], [1], [0, 0, 1, 1], [], []>} : vector<28x10xf32>, vector<10x128xf32>, vector<28x128xf32> -> vector<28x128xf32>
    %10 = arith.addf %4, %9 : vector<28x128xf32>
    %c0_15 = arith.constant 0 : index
    %c2 = arith.constant 2 : index
    %c0_16 = arith.constant 0 : index
    %c0_17 = arith.constant 0 : index
    %11 = vector.load %arg1[%c0_15, %c2, %c0_16, %c0_17] : memref<1x7x28x10xf32, #tpu.memory_space<vmem>>, vector<1x1x28x10xf32>
    %12 = vector.shape_cast %11 : vector<1x1x28x10xf32> to vector<28x10xf32>
    %c0_18 = arith.constant 0 : index
    %c2_19 = arith.constant 2 : index
    %c0_20 = arith.constant 0 : index
    %c0_21 = arith.constant 0 : index
    %13 = vector.load %arg2[%c0_18, %c2_19, %c0_20, %c0_21] : memref<1x5x10x128xf32, #tpu.memory_space<vmem>>, vector<1x1x10x128xf32>
    %14 = vector.shape_cast %13 : vector<1x1x10x128xf32> to vector<10x128xf32>
    %cst_22 = arith.constant dense<0.000000e+00> : vector<28x128xf32>
    %15 = tpu.matmul %12, %14, %cst_22 {dimension_numbers = #tpu.dot_dimension_numbers<[1], [0], [0], [1], [0, 0, 1, 1], [], []>} : vector<28x10xf32>, vector<10x128xf32>, vector<28x128xf32> -> vector<28x128xf32>
    %16 = arith.addf %10, %15 : vector<28x128xf32>
    %c0_23 = arith.constant 0 : index
    %c3 = arith.constant 3 : index
    %c0_24 = arith.constant 0 : index
    %c0_25 = arith.constant 0 : index
    %17 = vector.load %arg1[%c0_23, %c3, %c0_24, %c0_25] : memref<1x7x28x10xf32, #tpu.memory_space<vmem>>, vector<1x1x28x10xf32>
    %18 = vector.shape_cast %17 : vector<1x1x28x10xf32> to vector<28x10xf32>
    %c0_26 = arith.constant 0 : index
    %c3_27 = arith.constant 3 : index
    %c0_28 = arith.constant 0 : index
    %c0_29 = arith.constant 0 : index
    %19 = vector.load %arg2[%c0_26, %c3_27, %c0_28, %c0_29] : memref<1x5x10x128xf32, #tpu.memory_space<vmem>>, vector<1x1x10x128xf32>
    %20 = vector.shape_cast %19 : vector<1x1x10x128xf32> to vector<10x128xf32>
    %cst_30 = arith.constant dense<0.000000e+00> : vector<28x128xf32>
    %21 = tpu.matmul %18, %20, %cst_30 {dimension_numbers = #tpu.dot_dimension_numbers<[1], [0], [0], [1], [0, 0, 1, 1], [], []>} : vector<28x10xf32>, vector<10x128xf32>, vector<28x128xf32> -> vector<28x128xf32>
    %22 = arith.addf %16, %21 : vector<28x128xf32>
    %c0_31 = arith.constant 0 : index
    %c4 = arith.constant 4 : index
    %c0_32 = arith.constant 0 : index
    %c0_33 = arith.constant 0 : index
    %23 = vector.load %arg1[%c0_31, %c4, %c0_32, %c0_33] : memref<1x7x28x10xf32, #tpu.memory_space<vmem>>, vector<1x1x28x10xf32>
    %24 = vector.shape_cast %23 : vector<1x1x28x10xf32> to vector<28x10xf32>
    %c0_34 = arith.constant 0 : index
    %c4_35 = arith.constant 4 : index
    %c0_36 = arith.constant 0 : index
    %c0_37 = arith.constant 0 : index
    %25 = vector.load %arg2[%c0_34, %c4_35, %c0_36, %c0_37] : memref<1x5x10x128xf32, #tpu.memory_space<vmem>>, vector<1x1x10x128xf32>
    %26 = vector.shape_cast %25 : vector<1x1x10x128xf32> to vector<10x128xf32>
    %cst_38 = arith.constant dense<0.000000e+00> : vector<28x128xf32>
    %27 = tpu.matmul %24, %26, %cst_38 {dimension_numbers = #tpu.dot_dimension_numbers<[1], [0], [0], [1], [0, 0, 1, 1], [], []>} : vector<28x10xf32>, vector<10x128xf32>, vector<28x128xf32> -> vector<28x128xf32>
    %28 = arith.addf %22, %27 : vector<28x128xf32>
    %c0_39 = arith.constant 0 : index
    %c2_40 = arith.constant 2 : index
    %c0_41 = arith.constant 0 : index
    %c0_42 = arith.constant 0 : index
    %29 = vector.load %arg1[%c0_39, %c2_40, %c0_41, %c0_42] : memref<1x7x28x10xf32, #tpu.memory_space<vmem>>, vector<1x1x28x10xf32>
    %30 = vector.shape_cast %29 : vector<1x1x28x10xf32> to vector<28x10xf32>
    %c0_43 = arith.constant 0 : index
    %c0_44 = arith.constant 0 : index
    %c0_45 = arith.constant 0 : index
    %c0_46 = arith.constant 0 : index
    %31 = vector.load %arg2[%c0_43, %c0_44, %c0_45, %c0_46] : memref<1x5x10x128xf32, #tpu.memory_space<vmem>>, vector<1x1x10x128xf32>
    %32 = vector.shape_cast %31 : vector<1x1x10x128xf32> to vector<10x128xf32>
    %cst_47 = arith.constant dense<0.000000e+00> : vector<28x128xf32>
    %33 = tpu.matmul %30, %32, %cst_47 {dimension_numbers = #tpu.dot_dimension_numbers<[1], [0], [0], [1], [0, 0, 1, 1], [], []>} : vector<28x10xf32>, vector<10x128xf32>, vector<28x128xf32> -> vector<28x128xf32>
    %c0_48 = arith.constant 0 : index
    %c3_49 = arith.constant 3 : index
    %c0_50 = arith.constant 0 : index
    %c0_51 = arith.constant 0 : index
    %34 = vector.load %arg1[%c0_48, %c3_49, %c0_50, %c0_51] : memref<1x7x28x10xf32, #tpu.memory_space<vmem>>, vector<1x1x28x10xf32>
    %35 = vector.shape_cast %34 : vector<1x1x28x10xf32> to vector<28x10xf32>
    %c0_52 = arith.constant 0 : index
    %c1_53 = arith.constant 1 : index
    %c0_54 = arith.constant 0 : index
    %c0_55 = arith.constant 0 : index
    %36 = vector.load %arg2[%c0_52, %c1_53, %c0_54, %c0_55] : memref<1x5x10x128xf32, #tpu.memory_space<vmem>>, vector<1x1x10x128xf32>
    %37 = vector.shape_cast %36 : vector<1x1x10x128xf32> to vector<10x128xf32>
    %cst_56 = arith.constant dense<0.000000e+00> : vector<28x128xf32>
    %38 = tpu.matmul %35, %37, %cst_56 {dimension_numbers = #tpu.dot_dimension_numbers<[1], [0], [0], [1], [0, 0, 1, 1], [], []>} : vector<28x10xf32>, vector<10x128xf32>, vector<28x128xf32> -> vector<28x128xf32>
    %39 = arith.addf %33, %38 : vector<28x128xf32>
    %c0_57 = arith.constant 0 : index
    %c4_58 = arith.constant 4 : index
    %c0_59 = arith.constant 0 : index
    %c0_60 = arith.constant 0 : index
    %40 = vector.load %arg1[%c0_57, %c4_58, %c0_59, %c0_60] : memref<1x7x28x10xf32, #tpu.memory_space<vmem>>, vector<1x1x28x10xf32>
    %41 = vector.shape_cast %40 : vector<1x1x28x10xf32> to vector<28x10xf32>
    %c0_61 = arith.constant 0 : index
    %c2_62 = arith.constant 2 : index
    %c0_63 = arith.constant 0 : index
    %c0_64 = arith.constant 0 : index
    %42 = vector.load %arg2[%c0_61, %c2_62, %c0_63, %c0_64] : memref<1x5x10x128xf32, #tpu.memory_space<vmem>>, vector<1x1x10x128xf32>
    %43 = vector.shape_cast %42 : vector<1x1x10x128xf32> to vector<10x128xf32>
    %cst_65 = arith.constant dense<0.000000e+00> : vector<28x128xf32>
    %44 = tpu.matmul %41, %43, %cst_65 {dimension_numbers = #tpu.dot_dimension_numbers<[1], [0], [0], [1], [0, 0, 1, 1], [], []>} : vector<28x10xf32>, vector<10x128xf32>, vector<28x128xf32> -> vector<28x128xf32>
    %45 = arith.addf %39, %44 : vector<28x128xf32>
    %c0_66 = arith.constant 0 : index
    %c5 = arith.constant 5 : index
    %c0_67 = arith.constant 0 : index
    %c0_68 = arith.constant 0 : index
    %46 = vector.load %arg1[%c0_66, %c5, %c0_67, %c0_68] : memref<1x7x28x10xf32, #tpu.memory_space<vmem>>, vector<1x1x28x10xf32>
    %47 = vector.shape_cast %46 : vector<1x1x28x10xf32> to vector<28x10xf32>
    %c0_69 = arith.constant 0 : index
    %c3_70 = arith.constant 3 : index
    %c0_71 = arith.constant 0 : index
    %c0_72 = arith.constant 0 : index
    %48 = vector.load %arg2[%c0_69, %c3_70, %c0_71, %c0_72] : memref<1x5x10x128xf32, #tpu.memory_space<vmem>>, vector<1x1x10x128xf32>
    %49 = vector.shape_cast %48 : vector<1x1x10x128xf32> to vector<10x128xf32>
    %cst_73 = arith.constant dense<0.000000e+00> : vector<28x128xf32>
    %50 = tpu.matmul %47, %49, %cst_73 {dimension_numbers = #tpu.dot_dimension_numbers<[1], [0], [0], [1], [0, 0, 1, 1], [], []>} : vector<28x10xf32>, vector<10x128xf32>, vector<28x128xf32> -> vector<28x128xf32>
    %51 = arith.addf %45, %50 : vector<28x128xf32>
    %c0_74 = arith.constant 0 : index
    %c6 = arith.constant 6 : index
    %c0_75 = arith.constant 0 : index
    %c0_76 = arith.constant 0 : index
    %52 = vector.load %arg1[%c0_74, %c6, %c0_75, %c0_76] : memref<1x7x28x10xf32, #tpu.memory_space<vmem>>, vector<1x1x28x10xf32>
    %53 = vector.shape_cast %52 : vector<1x1x28x10xf32> to vector<28x10xf32>
    %c0_77 = arith.constant 0 : index
    %c4_78 = arith.constant 4 : index
    %c0_79 = arith.constant 0 : index
    %c0_80 = arith.constant 0 : index
    %54 = vector.load %arg2[%c0_77, %c4_78, %c0_79, %c0_80] : memref<1x5x10x128xf32, #tpu.memory_space<vmem>>, vector<1x1x10x128xf32>
    %55 = vector.shape_cast %54 : vector<1x1x10x128xf32> to vector<10x128xf32>
    %cst_81 = arith.constant dense<0.000000e+00> : vector<28x128xf32>
    %56 = tpu.matmul %53, %55, %cst_81 {dimension_numbers = #tpu.dot_dimension_numbers<[1], [0], [0], [1], [0, 0, 1, 1], [], []>} : vector<28x10xf32>, vector<10x128xf32>, vector<28x128xf32> -> vector<28x128xf32>
    %57 = arith.addf %51, %56 : vector<28x128xf32>
    %58 = arith.maximumf %28, %57 : vector<28x128xf32>
    %c0_82 = arith.constant 0 : index
    %c0_83 = arith.constant 0 : index
    %c0_84 = arith.constant 0 : index
    %59 = vector.load %arg3[%c0_82, %c0_83, %c0_84] : memref<1x1x128xf32, #tpu.memory_space<vmem>>, vector<1x1x128xf32>
    %60 = vector.shape_cast %59 : vector<1x1x128xf32> to vector<1x128xf32>
    %61 = vector.broadcast %60 : vector<1x128xf32> to vector<28x128xf32>
    %62 = arith.addf %58, %61 : vector<28x128xf32>
    %cst_85 = arith.constant 0.000000e+00 : f32
    %63 = vector.broadcast %cst_85 : f32 to vector<28x128xf32>
    %64 = arith.maximumf %62, %63 : vector<28x128xf32>
    %c0_86 = arith.constant 0 : index
    %c0_87 = arith.constant 0 : index
    %c0_88 = arith.constant 0 : index
    %65 = vector.load %arg4[%c0_86, %c0_87, %c0_88] : memref<1x1x128xf32, #tpu.memory_space<vmem>>, vector<1x1x128xf32>
    %66 = vector.shape_cast %65 : vector<1x1x128xf32> to vector<1x128xf32>
    %67 = vector.broadcast %66 : vector<1x128xf32> to vector<28x128xf32>
    %68 = arith.mulf %64, %67 : vector<28x128xf32>
    %c0_89 = arith.constant 0 : index
    %c0_90 = arith.constant 0 : index
    %c0_91 = arith.constant 0 : index
    %69 = vector.load %arg5[%c0_89, %c0_90, %c0_91] : memref<1x1x128xf32, #tpu.memory_space<vmem>>, vector<1x1x128xf32>
    %70 = vector.shape_cast %69 : vector<1x1x128xf32> to vector<1x128xf32>
    %71 = vector.broadcast %70 : vector<1x128xf32> to vector<28x128xf32>
    %72 = arith.addf %68, %71 : vector<28x128xf32>
    %73 = vector.extract_strided_slice %72 {offsets = [0, 0], sizes = [7, 128], strides = [1, 1]} : vector<28x128xf32> to vector<7x128xf32>
    %c0_92 = arith.constant 0 : index
    %c0_93 = arith.constant 0 : index
    %c0_94 = arith.constant 0 : index
    %c0_95 = arith.constant 0 : index
    %74 = vector.load %arg6[%c0_92, %c0_93, %c0_94, %c0_95] : memref<1x5x128x128xf32, #tpu.memory_space<vmem>>, vector<1x1x128x128xf32>
    %75 = vector.shape_cast %74 : vector<1x1x128x128xf32> to vector<128x128xf32>
    %cst_96 = arith.constant dense<0.000000e+00> : vector<7x128xf32>
    %76 = tpu.matmul %73, %75, %cst_96 {dimension_numbers = #tpu.dot_dimension_numbers<[1], [0], [0], [1], [0, 0, 1, 1], [], []>} : vector<7x128xf32>, vector<128x128xf32>, vector<7x128xf32> -> vector<7x128xf32>
    %77 = vector.extract_strided_slice %72 {offsets = [1, 0], sizes = [7, 128], strides = [1, 1]} : vector<28x128xf32> to vector<7x128xf32>
    %c0_97 = arith.constant 0 : index
    %c1_98 = arith.constant 1 : index
    %c0_99 = arith.constant 0 : index
    %c0_100 = arith.constant 0 : index
    %78 = vector.load %arg6[%c0_97, %c1_98, %c0_99, %c0_100] : memref<1x5x128x128xf32, #tpu.memory_space<vmem>>, vector<1x1x128x128xf32>
    %79 = vector.shape_cast %78 : vector<1x1x128x128xf32> to vector<128x128xf32>
    %cst_101 = arith.constant dense<0.000000e+00> : vector<7x128xf32>
    %80 = tpu.matmul %77, %79, %cst_101 {dimension_numbers = #tpu.dot_dimension_numbers<[1], [0], [0], [1], [0, 0, 1, 1], [], []>} : vector<7x128xf32>, vector<128x128xf32>, vector<7x128xf32> -> vector<7x128xf32>
    %81 = arith.addf %76, %80 : vector<7x128xf32>
    %82 = vector.extract_strided_slice %72 {offsets = [2, 0], sizes = [7, 128], strides = [1, 1]} : vector<28x128xf32> to vector<7x128xf32>
    %c0_102 = arith.constant 0 : index
    %c2_103 = arith.constant 2 : index
    %c0_104 = arith.constant 0 : index
    %c0_105 = arith.constant 0 : index
    %83 = vector.load %arg6[%c0_102, %c2_103, %c0_104, %c0_105] : memref<1x5x128x128xf32, #tpu.memory_space<vmem>>, vector<1x1x128x128xf32>
    %84 = vector.shape_cast %83 : vector<1x1x128x128xf32> to vector<128x128xf32>
    %cst_106 = arith.constant dense<0.000000e+00> : vector<7x128xf32>
    %85 = tpu.matmul %82, %84, %cst_106 {dimension_numbers = #tpu.dot_dimension_numbers<[1], [0], [0], [1], [0, 0, 1, 1], [], []>} : vector<7x128xf32>, vector<128x128xf32>, vector<7x128xf32> -> vector<7x128xf32>
    %86 = arith.addf %81, %85 : vector<7x128xf32>
    %87 = vector.extract_strided_slice %72 {offsets = [3, 0], sizes = [7, 128], strides = [1, 1]} : vector<28x128xf32> to vector<7x128xf32>
    %c0_107 = arith.constant 0 : index
    %c3_108 = arith.constant 3 : index
    %c0_109 = arith.constant 0 : index
    %c0_110 = arith.constant 0 : index
    %88 = vector.load %arg6[%c0_107, %c3_108, %c0_109, %c0_110] : memref<1x5x128x128xf32, #tpu.memory_space<vmem>>, vector<1x1x128x128xf32>
    %89 = vector.shape_cast %88 : vector<1x1x128x128xf32> to vector<128x128xf32>
    %cst_111 = arith.constant dense<0.000000e+00> : vector<7x128xf32>
    %90 = tpu.matmul %87, %89, %cst_111 {dimension_numbers = #tpu.dot_dimension_numbers<[1], [0], [0], [1], [0, 0, 1, 1], [], []>} : vector<7x128xf32>, vector<128x128xf32>, vector<7x128xf32> -> vector<7x128xf32>
    %91 = arith.addf %86, %90 : vector<7x128xf32>
    %92 = vector.extract_strided_slice %72 {offsets = [4, 0], sizes = [7, 128], strides = [1, 1]} : vector<28x128xf32> to vector<7x128xf32>
    %c0_112 = arith.constant 0 : index
    %c4_113 = arith.constant 4 : index
    %c0_114 = arith.constant 0 : index
    %c0_115 = arith.constant 0 : index
    %93 = vector.load %arg6[%c0_112, %c4_113, %c0_114, %c0_115] : memref<1x5x128x128xf32, #tpu.memory_space<vmem>>, vector<1x1x128x128xf32>
    %94 = vector.shape_cast %93 : vector<1x1x128x128xf32> to vector<128x128xf32>
    %cst_116 = arith.constant dense<0.000000e+00> : vector<7x128xf32>
    %95 = tpu.matmul %92, %94, %cst_116 {dimension_numbers = #tpu.dot_dimension_numbers<[1], [0], [0], [1], [0, 0, 1, 1], [], []>} : vector<7x128xf32>, vector<128x128xf32>, vector<7x128xf32> -> vector<7x128xf32>
    %96 = arith.addf %91, %95 : vector<7x128xf32>
    %c0_117 = arith.constant 0 : index
    %c0_118 = arith.constant 0 : index
    %c0_119 = arith.constant 0 : index
    %97 = vector.load %arg7[%c0_117, %c0_118, %c0_119] : memref<1x1x128xf32, #tpu.memory_space<vmem>>, vector<1x1x128xf32>
    %98 = vector.shape_cast %97 : vector<1x1x128xf32> to vector<1x128xf32>
    %99 = vector.broadcast %98 : vector<1x128xf32> to vector<7x128xf32>
    %100 = arith.addf %96, %99 : vector<7x128xf32>
    %cst_120 = arith.constant 0.000000e+00 : f32
    %101 = vector.broadcast %cst_120 : f32 to vector<7x128xf32>
    %102 = arith.maximumf %100, %101 : vector<7x128xf32>
    %103 = vector.extract_strided_slice %102 {offsets = [0, 0], sizes = [1, 128], strides = [1, 1]} : vector<7x128xf32> to vector<1x128xf32>
    %104 = vector.extract_strided_slice %102 {offsets = [2, 0], sizes = [1, 128], strides = [1, 1]} : vector<7x128xf32> to vector<1x128xf32>
    %105 = arith.maximumf %103, %104 : vector<1x128xf32>
    %c0_121 = arith.constant 0 : index
    %c0_122 = arith.constant 0 : index
    %c0_123 = arith.constant 0 : index
    %106 = vector.load %arg8[%c0_121, %c0_122, %c0_123] : memref<1x1x128xf32, #tpu.memory_space<vmem>>, vector<1x1x128xf32>
    %107 = vector.shape_cast %106 : vector<1x1x128xf32> to vector<1x128xf32>
    %108 = arith.mulf %105, %107 : vector<1x128xf32>
    %c0_124 = arith.constant 0 : index
    %c0_125 = arith.constant 0 : index
    %c0_126 = arith.constant 0 : index
    %109 = vector.load %arg9[%c0_124, %c0_125, %c0_126] : memref<1x1x128xf32, #tpu.memory_space<vmem>>, vector<1x1x128xf32>
    %110 = vector.shape_cast %109 : vector<1x1x128xf32> to vector<1x128xf32>
    %111 = arith.addf %108, %110 : vector<1x128xf32>
    %112 = vector.extract_strided_slice %102 {offsets = [4, 0], sizes = [1, 128], strides = [1, 1]} : vector<7x128xf32> to vector<1x128xf32>
    %113 = vector.extract_strided_slice %102 {offsets = [6, 0], sizes = [1, 128], strides = [1, 1]} : vector<7x128xf32> to vector<1x128xf32>
    %114 = arith.maximumf %112, %113 : vector<1x128xf32>
    %c0_127 = arith.constant 0 : index
    %c0_128 = arith.constant 0 : index
    %c0_129 = arith.constant 0 : index
    %115 = vector.load %arg8[%c0_127, %c0_128, %c0_129] : memref<1x1x128xf32, #tpu.memory_space<vmem>>, vector<1x1x128xf32>
    %116 = vector.shape_cast %115 : vector<1x1x128xf32> to vector<1x128xf32>
    %117 = arith.mulf %114, %116 : vector<1x128xf32>
    %c0_130 = arith.constant 0 : index
    %c0_131 = arith.constant 0 : index
    %c0_132 = arith.constant 0 : index
    %118 = vector.load %arg9[%c0_130, %c0_131, %c0_132] : memref<1x1x128xf32, #tpu.memory_space<vmem>>, vector<1x1x128xf32>
    %119 = vector.shape_cast %118 : vector<1x1x128xf32> to vector<1x128xf32>
    %120 = arith.addf %117, %119 : vector<1x128xf32>
    %c0_133 = arith.constant 0 : index
    %c0_134 = arith.constant 0 : index
    %c0_135 = arith.constant 0 : index
    %121 = vector.load %arg10[%c0_133, %c0_134, %c0_135] : memref<1x128x256xf32, #tpu.memory_space<vmem>>, vector<1x128x256xf32>
    %122 = vector.shape_cast %121 : vector<1x128x256xf32> to vector<128x256xf32>
    %cst_136 = arith.constant dense<0.000000e+00> : vector<1x256xf32>
    %123 = tpu.matmul %111, %122, %cst_136 {dimension_numbers = #tpu.dot_dimension_numbers<[1], [0], [0], [1], [0, 0, 1, 1], [], []>} : vector<1x128xf32>, vector<128x256xf32>, vector<1x256xf32> -> vector<1x256xf32>
    %c0_137 = arith.constant 0 : index
    %c0_138 = arith.constant 0 : index
    %c0_139 = arith.constant 0 : index
    %124 = vector.load %arg11[%c0_137, %c0_138, %c0_139] : memref<1x128x256xf32, #tpu.memory_space<vmem>>, vector<1x128x256xf32>
    %125 = vector.shape_cast %124 : vector<1x128x256xf32> to vector<128x256xf32>
    %cst_140 = arith.constant dense<0.000000e+00> : vector<1x256xf32>
    %126 = tpu.matmul %120, %125, %cst_140 {dimension_numbers = #tpu.dot_dimension_numbers<[1], [0], [0], [1], [0, 0, 1, 1], [], []>} : vector<1x128xf32>, vector<128x256xf32>, vector<1x256xf32> -> vector<1x256xf32>
    %127 = arith.addf %123, %126 : vector<1x256xf32>
    %c0_141 = arith.constant 0 : index
    %c0_142 = arith.constant 0 : index
    %c0_143 = arith.constant 0 : index
    %128 = vector.load %arg12[%c0_141, %c0_142, %c0_143] : memref<1x1x256xf32, #tpu.memory_space<vmem>>, vector<1x1x256xf32>
    %129 = vector.shape_cast %128 : vector<1x1x256xf32> to vector<1x256xf32>
    %130 = arith.addf %127, %129 : vector<1x256xf32>
    %cst_144 = arith.constant 0.000000e+00 : f32
    %131 = vector.broadcast %cst_144 : f32 to vector<1x256xf32>
    %132 = arith.maximumf %130, %131 : vector<1x256xf32>
    %c0_145 = arith.constant 0 : index
    %c0_146 = arith.constant 0 : index
    %c0_147 = arith.constant 0 : index
    %133 = vector.load %arg13[%c0_145, %c0_146, %c0_147] : memref<1x256x128xf32, #tpu.memory_space<vmem>>, vector<1x256x128xf32>
    %134 = vector.shape_cast %133 : vector<1x256x128xf32> to vector<256x128xf32>
    %cst_148 = arith.constant dense<0.000000e+00> : vector<1x128xf32>
    %135 = tpu.matmul %132, %134, %cst_148 {dimension_numbers = #tpu.dot_dimension_numbers<[1], [0], [0], [1], [0, 0, 1, 1], [], []>} : vector<1x256xf32>, vector<256x128xf32>, vector<1x128xf32> -> vector<1x128xf32>
    %c0_149 = arith.constant 0 : index
    %c0_150 = arith.constant 0 : index
    %c0_151 = arith.constant 0 : index
    %136 = vector.load %arg14[%c0_149, %c0_150, %c0_151] : memref<1x1x128xf32, #tpu.memory_space<vmem>>, vector<1x1x128xf32>
    %137 = vector.shape_cast %136 : vector<1x1x128xf32> to vector<1x128xf32>
    %138 = arith.addf %135, %137 : vector<1x128xf32>
    %cst_152 = arith.constant 0.000000e+00 : f32
    %139 = vector.broadcast %cst_152 : f32 to vector<1x128xf32>
    %140 = arith.maximumf %138, %139 : vector<1x128xf32>
    %c0_153 = arith.constant 0 : index
    %c0_154 = arith.constant 0 : index
    %c0_155 = arith.constant 0 : index
    %141 = vector.load %arg15[%c0_153, %c0_154, %c0_155] : memref<1x128x128xf32, #tpu.memory_space<vmem>>, vector<1x128x128xf32>
    %142 = vector.shape_cast %141 : vector<1x128x128xf32> to vector<128x128xf32>
    %cst_156 = arith.constant dense<0.000000e+00> : vector<1x128xf32>
    %143 = tpu.matmul %140, %142, %cst_156 {dimension_numbers = #tpu.dot_dimension_numbers<[1], [0], [0], [1], [0, 0, 1, 1], [], []>} : vector<1x128xf32>, vector<128x128xf32>, vector<1x128xf32> -> vector<1x128xf32>
    %c0_157 = arith.constant 0 : index
    %c0_158 = arith.constant 0 : index
    %c0_159 = arith.constant 0 : index
    %144 = vector.load %arg16[%c0_157, %c0_158, %c0_159] : memref<1x1x128xf32, #tpu.memory_space<vmem>>, vector<1x1x128xf32>
    %145 = vector.shape_cast %144 : vector<1x1x128xf32> to vector<1x128xf32>
    %146 = arith.addf %143, %145 : vector<1x128xf32>
    %cst_160 = arith.constant 0.000000e+00 : f32
    %147 = vector.broadcast %cst_160 : f32 to vector<1x128xf32>
    %148 = arith.maximumf %146, %147 : vector<1x128xf32>
    %149 = vector.shape_cast %148 : vector<1x128xf32> to vector<128xf32>
    %c0_161 = arith.constant 0 : index
    %c0_162 = arith.constant 0 : index
    %c0_163 = arith.constant 0 : index
    %150 = vector.load %arg17[%c0_161, %c0_162, %c0_163] : memref<1x2x128xf32, #tpu.memory_space<vmem>>, vector<1x1x128xf32>
    %151 = vector.shape_cast %150 : vector<1x1x128xf32> to vector<128xf32>
    %152 = vector.shape_cast %149 : vector<128xf32> to vector<1x1x128xf32>
    tpu.vector_store %arg17[%c0_161, %c0_162, %c0_163], %152 {strides = array<i32>} : memref<1x2x128xf32, #tpu.memory_space<vmem>>, vector<1x1x128xf32>,
    %153 = vector.extract_strided_slice %72 {offsets = [14, 0], sizes = [7, 128], strides = [1, 1]} : vector<28x128xf32> to vector<7x128xf32>
    %c0_164 = arith.constant 0 : index
    %c0_165 = arith.constant 0 : index
    %c0_166 = arith.constant 0 : index
    %c0_167 = arith.constant 0 : index
    %154 = vector.load %arg6[%c0_164, %c0_165, %c0_166, %c0_167] : memref<1x5x128x128xf32, #tpu.memory_space<vmem>>, vector<1x1x128x128xf32>
    %155 = vector.shape_cast %154 : vector<1x1x128x128xf32> to vector<128x128xf32>
    %cst_168 = arith.constant dense<0.000000e+00> : vector<7x128xf32>
    %156 = tpu.matmul %153, %155, %cst_168 {dimension_numbers = #tpu.dot_dimension_numbers<[1], [0], [0], [1], [0, 0, 1, 1], [], []>} : vector<7x128xf32>, vector<128x128xf32>, vector<7x128xf32> -> vector<7x128xf32>
    %157 = vector.extract_strided_slice %72 {offsets = [15, 0], sizes = [7, 128], strides = [1, 1]} : vector<28x128xf32> to vector<7x128xf32>
    %c0_169 = arith.constant 0 : index
    %c1_170 = arith.constant 1 : index
    %c0_171 = arith.constant 0 : index
    %c0_172 = arith.constant 0 : index
    %158 = vector.load %arg6[%c0_169, %c1_170, %c0_171, %c0_172] : memref<1x5x128x128xf32, #tpu.memory_space<vmem>>, vector<1x1x128x128xf32>
    %159 = vector.shape_cast %158 : vector<1x1x128x128xf32> to vector<128x128xf32>
    %cst_173 = arith.constant dense<0.000000e+00> : vector<7x128xf32>
    %160 = tpu.matmul %157, %159, %cst_173 {dimension_numbers = #tpu.dot_dimension_numbers<[1], [0], [0], [1], [0, 0, 1, 1], [], []>} : vector<7x128xf32>, vector<128x128xf32>, vector<7x128xf32> -> vector<7x128xf32>
    %161 = arith.addf %156, %160 : vector<7x128xf32>
    %162 = vector.extract_strided_slice %72 {offsets = [16, 0], sizes = [7, 128], strides = [1, 1]} : vector<28x128xf32> to vector<7x128xf32>
    %c0_174 = arith.constant 0 : index
    %c2_175 = arith.constant 2 : index
    %c0_176 = arith.constant 0 : index
    %c0_177 = arith.constant 0 : index
    %163 = vector.load %arg6[%c0_174, %c2_175, %c0_176, %c0_177] : memref<1x5x128x128xf32, #tpu.memory_space<vmem>>, vector<1x1x128x128xf32>
    %164 = vector.shape_cast %163 : vector<1x1x128x128xf32> to vector<128x128xf32>
    %cst_178 = arith.constant dense<0.000000e+00> : vector<7x128xf32>
    %165 = tpu.matmul %162, %164, %cst_178 {dimension_numbers = #tpu.dot_dimension_numbers<[1], [0], [0], [1], [0, 0, 1, 1], [], []>} : vector<7x128xf32>, vector<128x128xf32>, vector<7x128xf32> -> vector<7x128xf32>
    %166 = arith.addf %161, %165 : vector<7x128xf32>
    %167 = vector.extract_strided_slice %72 {offsets = [17, 0], sizes = [7, 128], strides = [1, 1]} : vector<28x128xf32> to vector<7x128xf32>
    %c0_179 = arith.constant 0 : index
    %c3_180 = arith.constant 3 : index
    %c0_181 = arith.constant 0 : index
    %c0_182 = arith.constant 0 : index
    %168 = vector.load %arg6[%c0_179, %c3_180, %c0_181, %c0_182] : memref<1x5x128x128xf32, #tpu.memory_space<vmem>>, vector<1x1x128x128xf32>
    %169 = vector.shape_cast %168 : vector<1x1x128x128xf32> to vector<128x128xf32>
    %cst_183 = arith.constant dense<0.000000e+00> : vector<7x128xf32>
    %170 = tpu.matmul %167, %169, %cst_183 {dimension_numbers = #tpu.dot_dimension_numbers<[1], [0], [0], [1], [0, 0, 1, 1], [], []>} : vector<7x128xf32>, vector<128x128xf32>, vector<7x128xf32> -> vector<7x128xf32>
    %171 = arith.addf %166, %170 : vector<7x128xf32>
    %172 = vector.extract_strided_slice %72 {offsets = [18, 0], sizes = [7, 128], strides = [1, 1]} : vector<28x128xf32> to vector<7x128xf32>
    %c0_184 = arith.constant 0 : index
    %c4_185 = arith.constant 4 : index
    %c0_186 = arith.constant 0 : index
    %c0_187 = arith.constant 0 : index
    %173 = vector.load %arg6[%c0_184, %c4_185, %c0_186, %c0_187] : memref<1x5x128x128xf32, #tpu.memory_space<vmem>>, vector<1x1x128x128xf32>
    %174 = vector.shape_cast %173 : vector<1x1x128x128xf32> to vector<128x128xf32>
    %cst_188 = arith.constant dense<0.000000e+00> : vector<7x128xf32>
    %175 = tpu.matmul %172, %174, %cst_188 {dimension_numbers = #tpu.dot_dimension_numbers<[1], [0], [0], [1], [0, 0, 1, 1], [], []>} : vector<7x128xf32>, vector<128x128xf32>, vector<7x128xf32> -> vector<7x128xf32>
    %176 = arith.addf %171, %175 : vector<7x128xf32>
    %c0_189 = arith.constant 0 : index
    %c0_190 = arith.constant 0 : index
    %c0_191 = arith.constant 0 : index
    %177 = vector.load %arg7[%c0_189, %c0_190, %c0_191] : memref<1x1x128xf32, #tpu.memory_space<vmem>>, vector<1x1x128xf32>
    %178 = vector.shape_cast %177 : vector<1x1x128xf32> to vector<1x128xf32>
    %179 = vector.broadcast %178 : vector<1x128xf32> to vector<7x128xf32>
    %180 = arith.addf %176, %179 : vector<7x128xf32>
    %cst_192 = arith.constant 0.000000e+00 : f32
    %181 = vector.broadcast %cst_192 : f32 to vector<7x128xf32>
    %182 = arith.maximumf %180, %181 : vector<7x128xf32>
    %183 = vector.extract_strided_slice %182 {offsets = [0, 0], sizes = [1, 128], strides = [1, 1]} : vector<7x128xf32> to vector<1x128xf32>
    %184 = vector.extract_strided_slice %182 {offsets = [2, 0], sizes = [1, 128], strides = [1, 1]} : vector<7x128xf32> to vector<1x128xf32>
    %185 = arith.maximumf %183, %184 : vector<1x128xf32>
    %c0_193 = arith.constant 0 : index
    %c0_194 = arith.constant 0 : index
    %c0_195 = arith.constant 0 : index
    %186 = vector.load %arg8[%c0_193, %c0_194, %c0_195] : memref<1x1x128xf32, #tpu.memory_space<vmem>>, vector<1x1x128xf32>
    %187 = vector.shape_cast %186 : vector<1x1x128xf32> to vector<1x128xf32>
    %188 = arith.mulf %185, %187 : vector<1x128xf32>
    %c0_196 = arith.constant 0 : index
    %c0_197 = arith.constant 0 : index
    %c0_198 = arith.constant 0 : index
    %189 = vector.load %arg9[%c0_196, %c0_197, %c0_198] : memref<1x1x128xf32, #tpu.memory_space<vmem>>, vector<1x1x128xf32>
    %190 = vector.shape_cast %189 : vector<1x1x128xf32> to vector<1x128xf32>
    %191 = arith.addf %188, %190 : vector<1x128xf32>
    %192 = vector.extract_strided_slice %182 {offsets = [4, 0], sizes = [1, 128], strides = [1, 1]} : vector<7x128xf32> to vector<1x128xf32>
    %193 = vector.extract_strided_slice %182 {offsets = [6, 0], sizes = [1, 128], strides = [1, 1]} : vector<7x128xf32> to vector<1x128xf32>
    %194 = arith.maximumf %192, %193 : vector<1x128xf32>
    %c0_199 = arith.constant 0 : index
    %c0_200 = arith.constant 0 : index
    %c0_201 = arith.constant 0 : index
    %195 = vector.load %arg8[%c0_199, %c0_200, %c0_201] : memref<1x1x128xf32, #tpu.memory_space<vmem>>, vector<1x1x128xf32>
    %196 = vector.shape_cast %195 : vector<1x1x128xf32> to vector<1x128xf32>
    %197 = arith.mulf %194, %196 : vector<1x128xf32>
    %c0_202 = arith.constant 0 : index
    %c0_203 = arith.constant 0 : index
    %c0_204 = arith.constant 0 : index
    %198 = vector.load %arg9[%c0_202, %c0_203, %c0_204] : memref<1x1x128xf32, #tpu.memory_space<vmem>>, vector<1x1x128xf32>
    %199 = vector.shape_cast %198 : vector<1x1x128xf32> to vector<1x128xf32>
    %200 = arith.addf %197, %199 : vector<1x128xf32>
    %c0_205 = arith.constant 0 : index
    %c0_206 = arith.constant 0 : index
    %c0_207 = arith.constant 0 : index
    %201 = vector.load %arg10[%c0_205, %c0_206, %c0_207] : memref<1x128x256xf32, #tpu.memory_space<vmem>>, vector<1x128x256xf32>
    %202 = vector.shape_cast %201 : vector<1x128x256xf32> to vector<128x256xf32>
    %cst_208 = arith.constant dense<0.000000e+00> : vector<1x256xf32>
    %203 = tpu.matmul %191, %202, %cst_208 {dimension_numbers = #tpu.dot_dimension_numbers<[1], [0], [0], [1], [0, 0, 1, 1], [], []>} : vector<1x128xf32>, vector<128x256xf32>, vector<1x256xf32> -> vector<1x256xf32>
    %c0_209 = arith.constant 0 : index
    %c0_210 = arith.constant 0 : index
    %c0_211 = arith.constant 0 : index
    %204 = vector.load %arg11[%c0_209, %c0_210, %c0_211] : memref<1x128x256xf32, #tpu.memory_space<vmem>>, vector<1x128x256xf32>
    %205 = vector.shape_cast %204 : vector<1x128x256xf32> to vector<128x256xf32>
    %cst_212 = arith.constant dense<0.000000e+00> : vector<1x256xf32>
    %206 = tpu.matmul %200, %205, %cst_212 {dimension_numbers = #tpu.dot_dimension_numbers<[1], [0], [0], [1], [0, 0, 1, 1], [], []>} : vector<1x128xf32>, vector<128x256xf32>, vector<1x256xf32> -> vector<1x256xf32>
    %207 = arith.addf %203, %206 : vector<1x256xf32>
    %c0_213 = arith.constant 0 : index
    %c0_214 = arith.constant 0 : index
    %c0_215 = arith.constant 0 : index
    %208 = vector.load %arg12[%c0_213, %c0_214, %c0_215] : memref<1x1x256xf32, #tpu.memory_space<vmem>>, vector<1x1x256xf32>
    %209 = vector.shape_cast %208 : vector<1x1x256xf32> to vector<1x256xf32>
    %210 = arith.addf %207, %209 : vector<1x256xf32>
    %cst_216 = arith.constant 0.000000e+00 : f32
    %211 = vector.broadcast %cst_216 : f32 to vector<1x256xf32>
    %212 = arith.maximumf %210, %211 : vector<1x256xf32>
    %c0_217 = arith.constant 0 : index
    %c0_218 = arith.constant 0 : index
    %c0_219 = arith.constant 0 : index
    %213 = vector.load %arg13[%c0_217, %c0_218, %c0_219] : memref<1x256x128xf32, #tpu.memory_space<vmem>>, vector<1x256x128xf32>
    %214 = vector.shape_cast %213 : vector<1x256x128xf32> to vector<256x128xf32>
    %cst_220 = arith.constant dense<0.000000e+00> : vector<1x128xf32>
    %215 = tpu.matmul %212, %214, %cst_220 {dimension_numbers = #tpu.dot_dimension_numbers<[1], [0], [0], [1], [0, 0, 1, 1], [], []>} : vector<1x256xf32>, vector<256x128xf32>, vector<1x128xf32> -> vector<1x128xf32>
    %c0_221 = arith.constant 0 : index
    %c0_222 = arith.constant 0 : index
    %c0_223 = arith.constant 0 : index
    %216 = vector.load %arg14[%c0_221, %c0_222, %c0_223] : memref<1x1x128xf32, #tpu.memory_space<vmem>>, vector<1x1x128xf32>
    %217 = vector.shape_cast %216 : vector<1x1x128xf32> to vector<1x128xf32>
    %218 = arith.addf %215, %217 : vector<1x128xf32>
    %cst_224 = arith.constant 0.000000e+00 : f32
    %219 = vector.broadcast %cst_224 : f32 to vector<1x128xf32>
    %220 = arith.maximumf %218, %219 : vector<1x128xf32>
    %c0_225 = arith.constant 0 : index
    %c0_226 = arith.constant 0 : index
    %c0_227 = arith.constant 0 : index
    %221 = vector.load %arg15[%c0_225, %c0_226, %c0_227] : memref<1x128x128xf32, #tpu.memory_space<vmem>>, vector<1x128x128xf32>
    %222 = vector.shape_cast %221 : vector<1x128x128xf32> to vector<128x128xf32>
    %cst_228 = arith.constant dense<0.000000e+00> : vector<1x128xf32>
    %223 = tpu.matmul %220, %222, %cst_228 {dimension_numbers = #tpu.dot_dimension_numbers<[1], [0], [0], [1], [0, 0, 1, 1], [], []>} : vector<1x128xf32>, vector<128x128xf32>, vector<1x128xf32> -> vector<1x128xf32>
    %c0_229 = arith.constant 0 : index
    %c0_230 = arith.constant 0 : index
    %c0_231 = arith.constant 0 : index
    %224 = vector.load %arg16[%c0_229, %c0_230, %c0_231] : memref<1x1x128xf32, #tpu.memory_space<vmem>>, vector<1x1x128xf32>
    %225 = vector.shape_cast %224 : vector<1x1x128xf32> to vector<1x128xf32>
    %226 = arith.addf %223, %225 : vector<1x128xf32>
    %cst_232 = arith.constant 0.000000e+00 : f32
    %227 = vector.broadcast %cst_232 : f32 to vector<1x128xf32>
    %228 = arith.maximumf %226, %227 : vector<1x128xf32>
    %229 = vector.shape_cast %228 : vector<1x128xf32> to vector<128xf32>
    %c0_233 = arith.constant 0 : index
    %c1_234 = arith.constant 1 : index
    %c0_235 = arith.constant 0 : index
    %230 = vector.load %arg17[%c0_233, %c1_234, %c0_235] : memref<1x2x128xf32, #tpu.memory_space<vmem>>, vector<1x1x128xf32>
    %231 = vector.shape_cast %230 : vector<1x1x128xf32> to vector<128xf32>
    %232 = vector.shape_cast %229 : vector<128xf32> to vector<1x1x128xf32>
    tpu.vector_store %arg17[%c0_233, %c1_234, %c0_235], %232 {strides = array<i32>} : memref<1x2x128xf32, #tpu.memory_space<vmem>>, vector<1x1x128xf32>,
    return
  }
  func.func @transform_0(%arg0: i32) -> (i32, i32, i32, i32) {
    %c0_i32 = arith.constant 0 : i32
    %c0_i32_0 = arith.constant 0 : i32
    %c0_i32_1 = arith.constant 0 : i32
    %c0_i32_2 = arith.constant 0 : i32
    return %arg0, %c0_i32, %c0_i32_0, %c0_i32_1 : i32, i32, i32, i32
  }
  func.func @transform_1(%arg0: i32) -> (i32, i32, i32, i32) {
    %c0_i32 = arith.constant 0 : i32
    %c0_i32_0 = arith.constant 0 : i32
    %c0_i32_1 = arith.constant 0 : i32
    %c0_i32_2 = arith.constant 0 : i32
    return %arg0, %c0_i32, %c0_i32_0, %c0_i32_1 : i32, i32, i32, i32
  }
  func.func @transform_2(%arg0: i32) -> (i32, i32, i32) {
    %c0_i32 = arith.constant 0 : i32
    %c0_i32_0 = arith.constant 0 : i32
    %c0_i32_1 = arith.constant 0 : i32
    return %arg0, %c0_i32, %c0_i32_0 : i32, i32, i32
  }
  func.func @transform_3(%arg0: i32) -> (i32, i32, i32) {
    %c0_i32 = arith.constant 0 : i32
    %c0_i32_0 = arith.constant 0 : i32
    %c0_i32_1 = arith.constant 0 : i32
    return %arg0, %c0_i32, %c0_i32_0 : i32, i32, i32
  }
  func.func @transform_4(%arg0: i32) -> (i32, i32, i32) {
    %c0_i32 = arith.constant 0 : i32
    %c0_i32_0 = arith.constant 0 : i32
    %c0_i32_1 = arith.constant 0 : i32
    return %arg0, %c0_i32, %c0_i32_0 : i32, i32, i32
  }
  func.func @transform_5(%arg0: i32) -> (i32, i32, i32, i32) {
    %c0_i32 = arith.constant 0 : i32
    %c0_i32_0 = arith.constant 0 : i32
    %c0_i32_1 = arith.constant 0 : i32
    %c0_i32_2 = arith.constant 0 : i32
    return %arg0, %c0_i32, %c0_i32_0, %c0_i32_1 : i32, i32, i32, i32
  }
  func.func @transform_6(%arg0: i32) -> (i32, i32, i32) {
    %c0_i32 = arith.constant 0 : i32
    %c0_i32_0 = arith.constant 0 : i32
    %c0_i32_1 = arith.constant 0 : i32
    return %arg0, %c0_i32, %c0_i32_0 : i32, i32, i32
  }
  func.func @transform_7(%arg0: i32) -> (i32, i32, i32) {
    %c0_i32 = arith.constant 0 : i32
    %c0_i32_0 = arith.constant 0 : i32
    %c0_i32_1 = arith.constant 0 : i32
    return %arg0, %c0_i32, %c0_i32_0 : i32, i32, i32
  }
  func.func @transform_8(%arg0: i32) -> (i32, i32, i32) {
    %c0_i32 = arith.constant 0 : i32
    %c0_i32_0 = arith.constant 0 : i32
    %c0_i32_1 = arith.constant 0 : i32
    return %arg0, %c0_i32, %c0_i32_0 : i32, i32, i32
  }
  func.func @transform_9(%arg0: i32) -> (i32, i32, i32) {
    %c0_i32 = arith.constant 0 : i32
    %c0_i32_0 = arith.constant 0 : i32
    %c0_i32_1 = arith.constant 0 : i32
    return %arg0, %c0_i32, %c0_i32_0 : i32, i32, i32
  }
  func.func @transform_10(%arg0: i32) -> (i32, i32, i32) {
    %c0_i32 = arith.constant 0 : i32
    %c0_i32_0 = arith.constant 0 : i32
    %c0_i32_1 = arith.constant 0 : i32
    return %arg0, %c0_i32, %c0_i32_0 : i32, i32, i32
  }
  func.func @transform_11(%arg0: i32) -> (i32, i32, i32) {
    %c0_i32 = arith.constant 0 : i32
    %c0_i32_0 = arith.constant 0 : i32
    %c0_i32_1 = arith.constant 0 : i32
    return %arg0, %c0_i32, %c0_i32_0 : i32, i32, i32
  }
  func.func @transform_12(%arg0: i32) -> (i32, i32, i32) {
    %c0_i32 = arith.constant 0 : i32
    %c0_i32_0 = arith.constant 0 : i32
    %c0_i32_1 = arith.constant 0 : i32
    return %arg0, %c0_i32, %c0_i32_0 : i32, i32, i32
  }
  func.func @transform_13(%arg0: i32) -> (i32, i32, i32) {
    %c0_i32 = arith.constant 0 : i32
    %c0_i32_0 = arith.constant 0 : i32
    %c0_i32_1 = arith.constant 0 : i32
    return %arg0, %c0_i32, %c0_i32_0 : i32, i32, i32
  }
  func.func @transform_14(%arg0: i32) -> (i32, i32, i32) {
    %c0_i32 = arith.constant 0 : i32
    %c0_i32_0 = arith.constant 0 : i32
    %c0_i32_1 = arith.constant 0 : i32
    return %arg0, %c0_i32, %c0_i32_0 : i32, i32, i32
  }
  func.func @transform_15(%arg0: i32) -> (i32, i32, i32) {
    %c0_i32 = arith.constant 0 : i32
    %c0_i32_0 = arith.constant 0 : i32
    %c0_i32_1 = arith.constant 0 : i32
    return %arg0, %c0_i32, %c0_i32_0 : i32, i32, i32
  }
  func.func @transform_16(%arg0: i32) -> (i32, i32, i32) {
    %c0_i32 = arith.constant 0 : i32
    %c0_i32_0 = arith.constant 0 : i32
    %c0_i32_1 = arith.constant 0 : i32
    return %arg0, %c0_i32, %c0_i32_0 : i32, i32, i32
  }
}

</mosaic_0001>

<bundles_post_ra>
// kernel: timeseries_net_light.1
= control target key start
LH: loop header
LB: loop body
LE: loop exit
PB: predicated region body
PF: predicated region fallthrough
CT: control target
= control target key end

     0   :  { %s6784_s0 = inlined_call_operand.vmem [shape: f32[4,7,28,10], index: 0, kind: input, shape index: {}]   ;;  %s6785_s1 = inlined_call_operand.hbm [shape: f32[4,5,10,128], index: 1, kind: input, shape index: {}]   ;;  %s6786_s2 = inlined_call_operand.vmem [shape: f32[4,1,128], index: 2, kind: input, shape index: {}, may-alias: {2,4,6,8,13,15}]   ;;  %s6787_s3 = inlined_call_operand.vmem [shape: f32[4,1,128], index: 3, kind: input, shape index: {}]   ;;  %s6788_s4 = inlined_call_operand.vmem [shape: f32[4,1,128], index: 4, kind: input, shape index: {}, may-alias: {2,4,6,8,13,15}]   ;;  %s6789_s5 = inlined_call_operand.vmem [shape: f32[4,5,128,128], index: 5, kind: input, shape index: {}]   ;;  %s6790_s6 = inlined_call_operand.vmem [shape: f32[4,1,128], index: 6, kind: input, shape index: {}, may-alias: {2,4,6,8,13,15}]   ;;  %s6791_s7 = inlined_call_operand.vmem [shape: f32[4,1,128], index: 7, kind: input, shape index: {}]   ;;  %s6792_s8 = inlined_call_operand.vmem [shape: f32[4,1,128], index: 8, kind: input, shape index: {}, may-alias: {2,4,6,8,13,15}]   ;;  %s6793_s9 = inlined_call_operand.vmem [shape: f32[4,128,256], index: 9, kind: input, shape index: {}]   ;;  %s6794_s10 = inlined_call_operand.vmem [shape: f32[4,128,256], index: 10, kind: input, shape index: {}]   ;;  %s6795_s11 = inlined_call_operand.vmem [shape: f32[4,1,256], index: 11, kind: input, shape index: {}]   ;;  %s6796_s12 = inlined_call_operand.vmem [shape: f32[4,256,128], index: 12, kind: input, shape index: {}]   ;;  %s6797_s13 = inlined_call_operand.vmem [shape: f32[4,1,128], index: 13, kind: input, shape index: {}, may-alias: {2,4,6,8,13,15}]   ;;  %s6798_s14 = inlined_call_operand.vmem [shape: f32[4,128,128], index: 14, kind: input, shape index: {}]   ;;  %s6799_s15 = inlined_call_operand.vmem [shape: f32[4,1,128], index: 15, kind: input, shape index: {}, may-alias: {2,4,6,8,13,15}]   ;;  %s6800_s16 = inlined_call_operand.vmem [shape: f32[4,2,128], index: 16, kind: output, shape index: {}]  }
   0x1   :  { %6806 = sst [smem:[#allocation8_spill]] %s6784_s0 }
   0x2   :  { %6807 = sst [smem:[#allocation9_spill]] %s6800_s16 }
   0x3   :  { %21 = vsyncpa [#allocation3], 0 }
   0x4   :  { %23 = vsyncpa [#allocation3 + $0x1], 0  ;;  %s5754_s21 = smov 0   ;;  %s5756_s22 = smov 0  }
   0x5   :  { %s5758_s23 = smov 0   ;;  %s5760_s24 = smov 0  }
   0x6 LB: > { %6808 = sst [smem:[#allocation5_spill]] %s5656_s23  ;;  %s5773_s25 = sadd.s32 4294967295, %s5660_s24   ;;  %s5660_s24 = sphi %s5760_s24, %s6819_s24   ;;  %s5656_s23 = sphi %s5758_s23, %s6821_s23   ;;  %s5652_s22 = sphi %s5756_s22, %s6823_s22   ;;  %s5648_s21 = sphi %s5754_s21, %s6822_s21  }
   0x7   : > { %s5776_s26 = sadd.s32 1, %s5660_s24   ;;  %s62_s28 = sadd.s32 1, %s5656_s23 }
   0x8   : > { %6809 = sst [smem:[#allocation6_spill]] %s5776_s26  ;;  %s59_s27 = ssub.s32 %s5660_s24, %s5776_s26 }
   0x9   : > { %p60_p0 = scmp.eq.s32.totalorder %s59_s27, 0  ;;  %p69_p1 = scmp.ne.s32.totalorder %s5656_s23, %s5652_s22 }
   0xa   : > { %p70_p2 = scmp.eq.s32.totalorder %s5660_s24, 0  ;;  %p75_p3 = scmp.ne.s32.totalorder %s5652_s22, %s5648_s21 }
   0xb   : > { %s5786_s29 = scalar_select %p60_p0, %s5656_s23, %s62_s28  }
   0xc   : > { %p71_p4 = por %p70_p2, %p69_p1  ;;  %p76_p5 = scmp.eq.s32.totalorder %s5773_s25, 0 }
   0xd   : > { %6810 = sst [smem:[#allocation7_spill]] %s5786_s29  ;;  %p5557_p6 = scmp.lt.s32.totalorder %s5660_s24, 4 }
   0xe   : > { %p5790_p7 = por %p76_p5, %p75_p3  ;;  %s497_s0 = sand.u32 1, %s5656_s23  }
   0xf   : > { %s5546_s17 = smul.u32 80, %s497_s0  ;;  %p5796_p8 = pnand %p5557_p6, %p71_p4 }
  0x10   : > { %s5547_s18 = smul.u32 1280, %s5660_s24  ;;  %s5808_s23 = scalar_lea.sflag [#allocation3], %s497_s0 }
  0x11   : > { %s501_s28 = scalar_lea.vmem [#allocation2], %s5546_s17  ;;  %p5598_p11 = pneg %p5796_p8 }
  0x12   : > { %s5803_s21 = scalar_lea.hbm %s6785_s1, %s5547_s18  ;;  %s508_s29 = sshll.u32 %s501_s28, 4  ;;  %s5805_s29 = int_to_ptr.vmem [resolvable:$true] %s508_s29 }
  0x13   : > { %s5596_s26 = scalar_lea.hbm %s5803_s21, 1280  ;;  %s5601_s27 = scalar_lea.hbm %s6785_s1, 5120 }
  0x14   : > { %p5597_p10 = scmp.ne.s32.totalorder %s5803_s21, %s5596_s26  ;;  %p5602_p0 = scmp.lt.u32.totalorder %s5803_s21, %s6785_s1 }
  0x15   : > { %p5603_p1 = scmp.lt.u32.totalorder %s5601_s27, %s5596_s26  ;;  %p5605_p3 = scmp.lt.u32.totalorder %s5596_s26, %s5803_s21 }
  0x16   : > { %p5599_p12 = pnand %p5598_p11, %p5597_p10 }
  0x17   : > { %p5604_p2 = por %p5603_p1, %p5602_p0 }
  0x18   : > { %p5600_p13 = pneg %p5599_p12 }
  0x19   : > { %p5606_p4 = por %p5605_p3, %p5604_p2 }
  0x1b   : > { %p5607_p5 = pnand %p5606_p4, %p5600_p13 }
  0x1d   : > { %5610 = shalt.err (!%p5607_p5)
}
  0x1e   : > { %s5611_s0 = scalar_lea.vmem %s5805_s29, 1280  ;;  %s5662_s28 = smov [#allocation2]  }
  0x1f   : > { %p5612_p6 = scmp.ne.s32.totalorder %s5805_s29, %s5611_s0  ;;  %s5616_s18 = sshll.u32 %s5662_s28, 4  ;;  %s5617_s18 = int_to_ptr.vmem [resolvable:$false] %s5616_s18 }
  0x20   : > { %s5618_s16 = scalar_lea.vmem %s5617_s18, 2560  ;;  %p5619_p9 = scmp.lt.s32.totalorder %s5805_s29, %s5617_s18 }
  0x21   : > { %p5614_p10 = pnand %p5612_p6, %p5598_p11  ;;  %p5620_p0 = scmp.lt.s32.totalorder %s5618_s16, %s5611_s0 }
  0x23   : > { %p5615_p12 = pneg %p5614_p10  ;;  %p5621_p1 = por %p5620_p0, %p5619_p9 }
  0x25   : > { %p5622_p2 = pnand %p5621_p1, %p5615_p12 }
  0x27   : > { %5625 = shalt.err (!%p5622_p2)
}
  0x28   : > { %s5663_s26 = smov 128   ;;  %s5664_s20 = smov 8  }
  0x29   : > { %5556 = dma.hbm_to_vmem [thread:$0]  (!%p5796_p8), %s5803_s21, 1280, %s5805_s29, %s5808_s23, %s5663_s26, %s5663_s26, %s5664_s20  }
  0x2a   : > { %p611_p11 = scmp.lt.s32.totalorder %s5660_s24, 5  ;;  %p6813_p13 = scmp.ge.s32.totalorder %s5660_s24, 1 }
  0x2c   : > { %p612_p3 = pnand %p6813_p13, %p611_p11 }
  0x2d   : > { %s617_s27 = sand.u32 (!%p612_p3), 1, %s5652_s22  }
  0x2e   : > { %615 = sbr.rel (%p612_p3) target bundleno = 2062 (0x80e), region = 84  ;;  %s618_s0 = scalar_lea.sflag (!%p612_p3), [#allocation3], %s617_s27 }
  0x2f   : > { %s5548_s17 = smul.u32 (!%p612_p3), 80, %s617_s27 }
  0x31   : > { %s5840_s28 = scalar_lea.vmem (!%p612_p3), [#allocation2], %s5548_s17 }
  0x35   : > { %5643 = dma.done.wait (%p5790_p7), %s618_s0, 1280  }
  0x36   : > { %5645 = vsyncadd (%p5790_p7), %s618_s0, 4294966016  ;;  %p727_p8 = scmp.lt.s32.totalorder %s5773_s25, 3  ;;  %vm816_vm0 = vcmask 1041408   ;;  %vm803_vm1 = vcmask 80896   ;;  %vm5665_vm2 = vmmov 1   ;;  %s6816_s30 = sld [smem:[#allocation8_spill]] }
  0x37   : > { %vm5852_vm3 = vmpackc.low %vm816_vm0, %vm5665_vm2  ;;  %v3899_v1 = vld [vmem:[%s5840_s28 + $0x10] sm:$0xff]  ;;  %v3900_v2 = vld [vmem:[%s5840_s28 + $0x18] sm:$0x3]  ;;  %v5666_v42 = vmov 0.0|0.0   ;;  %vm5667_vm4 = vmmov 0   ;;  %vm2140_vm5 = vcmask 1044480  }
  0x38   : > { %s6825_s25 = smov (!%p727_p8, %s5773_s25), 3  ;;  %v4970_v4 = vpack.c.bf16 %v3900_v2, %v3899_v1  ;;  %v793_v6 = vld [vmem:[%s5840_s28] sm:$0xff]  ;;  %v794_v7 = vld [vmem:[%s5840_s28 + $0x8] sm:$0x3]  ;;  %v3926_v20 = vld [vmem:[%s5840_s28 + $0x30] sm:$0xff]  ;;  %vm2047_vm6 = vcmask 1045504  }
  0x39   : > { %s5549_s23 = smul.u32 224, %s6825_s25  ;;  %v4976_v8 = vpack.c.bf16 %v794_v7, %v793_v6  ;;  %v3915_v11 = vld [vmem:[%s5840_s28 + $0x20] sm:$0xff]  ;;  %v3916_v12 = vld [vmem:[%s5840_s28 + $0x28] sm:$0x3]  ;;  %v3927_v21 = vld [vmem:[%s5840_s28 + $0x38] sm:$0x3]  ;;  %s734_s17 = scalar_lea.vmem %s6786_s2, %s6825_s25 }
  0x3a   : > { %4972 = vmatprep.subr.msk.bf16.mxu0 %vm5852_vm3, %v4970_v4  ;;  %5002 = vmatprep.subr.msk.bf16.mxu1 %vm5852_vm3, %v4970_v4  ;;  %v4982_v15 = vpack.c.bf16 %v3916_v12, %v3915_v11  ;;  %v4988_v26 = vpack.c.bf16 %v3927_v21, %v3926_v20  ;;  %v3937_v30 = vld [vmem:[%s5840_s28 + $0x40] sm:$0xff]  ;;  %v3938_v31 = vld [vmem:[%s5840_s28 + $0x48] sm:$0x3]  ;;  %s5550_s21 = smul.u32 640, %s6825_s25  ;;  %vm2233_vm7 = vcmask 1043456   ;;  %s6310_s20 = scalar_lea.vmem %s6792_s8, %s6825_s25  ;;  %vm2791_vm8 = vcmask 1040384  }
  0x3b   : > { %4975 = vmatpush3.bf16.msk.msra.mxu0 %vm5852_vm3, %v4970_v4  ;;  %5005 = vmatpush3.bf16.msk.msra.mxu1 %vm5852_vm3, %v4970_v4  ;;  %v4994_v34 = vpack.c.bf16 %v3938_v31, %v3937_v30  ;;  %s4115_s18 = sshll.u32 %s6825_s25, 7  ;;  %s6685_s0 = scalar_lea.vmem %s6799_s15, %s6825_s25 }
  0x3c   : > { %s5859_s19 = scalar_lea.vmem %s6816_s30, %s5549_s23  ;;  %4978 = vmatprep.subr.msk.bf16.mxu0 %vm5852_vm3, %v4976_v8  ;;  %5008 = vmatprep.subr.msk.bf16.mxu1 %vm5852_vm3, %v4976_v8  ;;  %s5972_s26 = scalar_lea.vmem %s6789_s5, %s5550_s21 }
  0x3d   : > { %v3895_v3 = vld [vmem:[%s5859_s19 + $0x20] sm:$0xff]  ;;  %v3896_v9 = vld [vmem:[%s5859_s19 + $0x28] sm:$0xff]  ;;  %v3897_v13 = vld [vmem:[%s5859_s19 + $0x30] sm:$0xff]  ;;  %s737_s23 = scalar_lea.vmem %s6787_s3, %s6825_s25  ;;  %s740_s30 = scalar_lea.vmem %s6788_s4, %s6825_s25 }
  0x3e   : > { %4454 = vmatprep.mubr.msk.f32.mxu0 %vm803_vm1, %v3895_v3  ;;  %v5866_v5 = vld [vmem:[%s5859_s19 + $0x60] sm:$0xff]  ;;  %v5882_v10 = vld [vmem:[%s5859_s19 + $0x68] sm:$0xff]  ;;  %v5892_v14 = vld [vmem:[%s5859_s19 + $0x70] sm:$0xff]  ;;  %s6818_s24 = sld [smem:[#allocation9_spill]] }
  0x3f   : > { %4504 = vmatprep.mubr.msk.f32.mxu1 %vm803_vm1, %v5866_v5  ;;  %4455 = vmatmul.mubr.msk.f32.vlgmr.msra.gmra.mrb[0].mxu0 %vm803_vm1, %v3896_v9  ;;  %v3898_v16 = vld [vmem:[%s5859_s19 + $0x38] sm:$0xf]  ;;  %v789_v18 = vld [vmem:[%s5859_s19] sm:$0xff]  ;;  %v790_v22 = vld [vmem:[%s5859_s19 + $0x8] sm:$0xff] }
  0x40   : > { %4505 = vmatmul.mubr.msk.f32.vlgmr.msra.gmra.mrb[0].mxu1 %vm803_vm1, %v5882_v10  ;;  %4981 = vmatpush3.bf16.msk.msra.mxu0 %vm5852_vm3, %v4976_v8  ;;  %v5903_v17 = vld [vmem:[%s5859_s19 + $0x78] sm:$0xf]  ;;  %v3911_v19 = vld [vmem:[%s5859_s19 + $0x40] sm:$0xff]  ;;  %v3912_v23 = vld [vmem:[%s5859_s19 + $0x48] sm:$0xff] }
  0x41   : > { %5011 = vmatpush3.bf16.msk.msra.mxu1 %vm5852_vm3, %v4976_v8  ;;  %4457 = vmatprep.mubr.msk.f32.mxu0 %vm803_vm1, %v3897_v13  ;;  %v791_v24 = vld [vmem:[%s5859_s19 + $0x10] sm:$0xff]  ;;  %v792_v27 = vld [vmem:[%s5859_s19 + $0x18] sm:$0xf]  ;;  %v3933_v29 = vld [vmem:[%s5859_s19 + $0x80] sm:$0xff] }
  0x42   : > { %4507 = vmatprep.mubr.msk.f32.mxu1 %vm803_vm1, %v5892_v14  ;;  %4984 = vmatprep.subr.msk.bf16.mxu0 %vm5852_vm3, %v4982_v15  ;;  %v3913_v25 = vld [vmem:[%s5859_s19 + $0x50] sm:$0xff]  ;;  %v3914_v28 = vld [vmem:[%s5859_s19 + $0x58] sm:$0xf]  ;;  %v3934_v32 = vld [vmem:[%s5859_s19 + $0x88] sm:$0xff] }
  0x43   : > { %5014 = vmatprep.subr.msk.bf16.mxu1 %vm5852_vm3, %v4982_v15  ;;  %4458 = vmatmul.mubr.msk.f32.gmra.mrb[2].mxu0 %vm803_vm1, %v3898_v16  ;;  %v3935_v33 = vld [vmem:[%s5859_s19 + $0x90] sm:$0xff]  ;;  %v3936_v35 = vld [vmem:[%s5859_s19 + $0x98] sm:$0xf]  ;;  %v3959_v36 = vld [vmem:[%s5859_s19 + $0xa0] sm:$0xff] }
  0x44   : > { %4508 = vmatmul.mubr.msk.f32.gmra.mrb[2].mxu1 %vm803_vm1, %v5903_v17  ;;  %4464 = vmatprep.mubr.msk.f32.mxu0 %vm803_vm1, %v789_v18  ;;  %v3960_v37 = vld [vmem:[%s5859_s19 + $0xa8] sm:$0xff]  ;;  %v3961_v38 = vld [vmem:[%s5859_s19 + $0xb0] sm:$0xff]  ;;  %v3962_v39 = vld [vmem:[%s5859_s19 + $0xb8] sm:$0xf] }
  0x45   : > { %4514 = vmatprep.mubr.msk.f32.mxu1 %vm803_vm1, %v3911_v19  ;;  %v3968_v40 = vld [vmem:[%s5859_s19 + $0xc0] sm:$0xff]  ;;  %v1854_v43 = vld [vmem:[%s5972_s26 + $0x8] sm:$0xff]  ;;  %v3970_v47 = vld [vmem:[%s5859_s19 + $0xd0] sm:$0xff] }
  0x46   : > { %v1853_v41 = vld [vmem:[%s5972_s26] sm:$0xff]  ;;  %v3981_v45 = vld [vmem:[%s5972_s26 + $0x88] sm:$0xff]  ;;  %v1855_v50 = vld [vmem:[%s5972_s26 + $0x10] sm:$0xff] }
  0x47   : > { %4465 = vmatmul.mubr.msk.f32.vlgmr.msra.gmra.mrb[0].mxu0 %vm803_vm1, %v790_v22  ;;  %v3980_v44 = vld [vmem:[%s5972_s26 + $0x80] sm:$0xff]  ;;  %v3969_v46 = vld [vmem:[%s5859_s19 + $0xc8] sm:$0xff]  ;;  %v5055_v48 = vpack.c.bf16 %v1854_v43, %v1853_v41  ;;  %v1856_v51 = vld [vmem:[%s5972_s26 + $0x18] sm:$0xff] }
  0x48   : > { %4515 = vmatmul.mubr.msk.f32.vlgmr.msra.gmra.mrb[0].mxu1 %vm803_vm1, %v3912_v23  ;;  %4987 = vmatpush3.bf16.msk.msra.mxu0 %vm5852_vm3, %v4982_v15  ;;  %v6000_v49 = vpack.c.bf16 %v3981_v45, %v3980_v44  ;;  %v3982_v52 = vld [vmem:[%s5972_s26 + $0x90] sm:$0xff]  ;;  %v3983_v53 = vld [vmem:[%s5972_s26 + $0x98] sm:$0xff]  ;;  %v5058_v55 = vpack.c.bf16 %v1856_v51, %v1855_v50  ;;  %v1857_v57 = vld [vmem:[%s5972_s26 + $0x20] sm:$0xff] }
  0x49   : > { %5017 = vmatpush3.bf16.msk.msra.mxu1 %vm5852_vm3, %v4982_v15  ;;  %4467 = vmatprep.mubr.msk.f32.mxu0 %vm803_vm1, %v791_v24  ;;  %v3971_v54 = vld [vmem:[%s5859_s19 + $0xd8] sm:$0xf]  ;;  %v6012_v56 = vpack.c.bf16 %v3983_v53, %v3982_v52  ;;  %v1858_v58 = vld [vmem:[%s5972_s26 + $0x28] sm:$0xff]  ;;  %v3984_v59 = vld [vmem:[%s5972_s26 + $0xa0] sm:$0xff]  ;;  %s6240_s19 = sshll.u32 %s6825_s25, 8 }
  0x4a   : > { %4517 = vmatprep.mubr.msk.f32.mxu1 %vm803_vm1, %v3913_v25  ;;  %4990 = vmatprep.subr.msk.bf16.mxu0 %vm5852_vm3, %v4988_v26  ;;  %v3985_v60 = vld [vmem:[%s5972_s26 + $0xa8] sm:$0xff]  ;;  %v5061_v61 = vpack.c.bf16 %v1858_v58, %v1857_v57  ;;  %v1859_v63 = vld [vmem:[%s5972_s26 + $0x30] sm:$0xff]  ;;  %v1860_v0 = vld [vmem:[%s5972_s26 + $0x38] sm:$0xff]  ;;  %s6246_s16 = scalar_lea.vmem %s6794_s10, %s6240_s19  ;;  %s6333_s28 = scalar_lea.vmem %s6796_s12, %s6240_s19 }
  0x4b   : > { %5020 = vmatprep.subr.msk.bf16.mxu1 %vm5852_vm3, %v4988_v26  ;;  %4468 = vmatmul.mubr.msk.f32.gmra.mrb[2].mxu0 %vm803_vm1, %v792_v27  ;;  %v6023_v62 = vpack.c.bf16 %v3985_v60, %v3984_v59  ;;  %v3986_v1 = vld [vmem:[%s5972_s26 + $0xb0] sm:$0xff]  ;;  %v3987_v2 = vld [vmem:[%s5972_s26 + $0xb8] sm:$0xff]  ;;  %v5064_v3 = vpack.c.bf16 %v1860_v0, %v1859_v63  ;;  %v1862_v6 = vld [vmem:[%s5972_s26 + $0x48] sm:$0xff] }
  0x4c   : > { %4518 = vmatmul.mubr.msk.f32.gmra.mrb[2].mxu1 %vm803_vm1, %v3914_v28  ;;  %4474 = vmatprep.mubr.msk.f32.mxu0 %vm803_vm1, %v3911_v19  ;;  %v6032_v4 = vpack.c.bf16 %v3987_v2, %v3986_v1  ;;  %v3988_v7 = vld [vmem:[%s5972_s26 + $0xc0] sm:$0xff]  ;;  %v3989_v8 = vld [vmem:[%s5972_s26 + $0xc8] sm:$0xff]  ;;  %v1863_v11 = vld [vmem:[%s5972_s26 + $0x50] sm:$0xff] }
  0x4d   : > { %4524 = vmatprep.mubr.msk.f32.mxu1 %vm803_vm1, %v3933_v29  ;;  %v1864_v12 = vld [vmem:[%s5972_s26 + $0x58] sm:$0xff]  ;;  %v1866_v18 = vld [vmem:[%s5972_s26 + $0x68] sm:$0xff]  ;;  %v3992_v20 = vld [vmem:[%s5972_s26 + $0xe0] sm:$0xff] }
  0x4e   : > { %v5070_v13 = vpack.c.bf16 %v1864_v12, %v1863_v11  ;;  %v3991_v15 = vld [vmem:[%s5972_s26 + $0xd8] sm:$0xff]  ;;  %v3993_v21 = vld [vmem:[%s5972_s26 + $0xe8] sm:$0xff]  ;;  %v3979_v50 = vld [vmem:[%s740_s30] ss:$0 sm:$0xff]  ;;  %s6301_s30 = scalar_lea.vmem %s6791_s7, %s6825_s25 }
  0x4f   : > { %4475 = vmatmul.mubr.msk.f32.vlgmr.msra.gmra.mrb[0].mxu0 %vm803_vm1, %v3912_v23  ;;  %v6061_v22 = vpack.c.bf16 %v3993_v21, %v3992_v20  ;;  %v1867_v23 = vld [vmem:[%s5972_s26 + $0x70] sm:$0xff]  ;;  %v1868_v24 = vld [vmem:[%s5972_s26 + $0x78] sm:$0xff]  ;;  %v3996_v53 = vld [vmem:[%s5972_s26 + $0x100] sm:$0xff] }
  0x50   : > { %4525 = vmatmul.mubr.msk.f32.vlgmr.msra.gmra.mrb[0].mxu1 %vm803_vm1, %v3934_v32  ;;  %4993 = vmatpush3.bf16.msk.msra.mxu0 %vm5852_vm3, %v4988_v26  ;;  %v3995_v27 = vld [vmem:[%s5972_s26 + $0xf8] sm:$0xff] }
  0x51   : > { %5023 = vmatpush3.bf16.msk.msra.mxu1 %vm5852_vm3, %v4988_v26  ;;  %4477 = vmatprep.mubr.msk.f32.mxu0 %vm803_vm1, %v3913_v25  ;;  %v5076_v25 = vpack.c.bf16 %v1868_v24, %v1867_v23  ;;  %v3994_v26 = vld [vmem:[%s5972_s26 + $0xf0] sm:$0xff]  ;;  %v4016_v23 = vld [vmem:[%s5972_s26 + $0x1a0] sm:$0xff]  ;;  %v4017_v24 = vld [vmem:[%s5972_s26 + $0x1a8] sm:$0xff] }
  0x52   : > { %4527 = vmatprep.mubr.msk.f32.mxu1 %vm803_vm1, %v3935_v33  ;;  %4996 = vmatprep.subr.msk.bf16.mxu0 %vm5852_vm3, %v4994_v34 }
  0x53   : > { %5026 = vmatprep.subr.msk.bf16.mxu1 %vm5852_vm3, %v4994_v34  ;;  %4478 = vmatmul.mubr.msk.f32.gmra.mrb[2].mxu0 %vm803_vm1, %v3914_v28  ;;  %v6070_v28 = vpack.c.bf16 %v3995_v27, %v3994_v26 }
  0x54   : > { %4528 = vmatmul.mubr.msk.f32.gmra.mrb[2].mxu1 %vm803_vm1, %v3936_v35  ;;  %4484 = vmatprep.mubr.msk.f32.mxu0 %vm803_vm1, %v5866_v5  ;;  %v1861_v5 = vld [vmem:[%s5972_s26 + $0x40] sm:$0xff] }
  0x55   : > { %4534 = vmatprep.mubr.msk.f32.mxu1 %vm803_vm1, %v3959_v36  ;;  %v5067_v9 = vpack.c.bf16 %v1862_v6, %v1861_v5  ;;  %v4015_v5 = vld [vmem:[%s5972_s26 + $0x198] sm:$0xff] }
  0x57   : > { %4485 = vmatmul.mubr.msk.f32.vlgmr.msra.gmra.mrb[0].mxu0 %vm803_vm1, %v5882_v10  ;;  %v6041_v10 = vpack.c.bf16 %v3989_v8, %v3988_v7 }
  0x58   : > { %4535 = vmatmul.mubr.msk.f32.vlgmr.msra.gmra.mrb[0].mxu1 %vm803_vm1, %v3960_v37  ;;  %4999 = vmatpush3.bf16.msk.msra.mxu0 %vm5852_vm3, %v4994_v34 }
  0x59   : > { %5029 = vmatpush3.bf16.msk.msra.mxu1 %vm5852_vm3, %v4994_v34  ;;  %4487 = vmatprep.mubr.msk.f32.mxu0 %vm803_vm1, %v5892_v14  ;;  %v3990_v14 = vld [vmem:[%s5972_s26 + $0xd0] sm:$0xff] }
  0x5a   : > { %4537 = vmatprep.mubr.msk.f32.mxu1 %vm803_vm1, %v3961_v38  ;;  %5054 = vmatprep.subr.bf16.mxu1 %v5666_v42  ;;  %v6052_v16 = vpack.c.bf16 %v3991_v15, %v3990_v14  ;;  %v3978_v38 = vld [vmem:[%s737_s23] ss:$0 sm:$0xff]  ;;  %v3999_v14 = vld [vmem:[%s5972_s26 + $0x118] sm:$0xff]  ;;  %s6292_s23 = scalar_lea.vmem %s6790_s6, %s6825_s25 }
  0x5b   : > { %5030 = vmatprep.subr.bf16.mxu0 %v5666_v42  ;;  %4488 = vmatmul.mubr.msk.f32.gmra.mrb[2].mxu0 %vm803_vm1, %v5903_v17  ;;  %v1865_v17 = vld [vmem:[%s5972_s26 + $0x60] sm:$0xff] }
  0x5c   : > { %4538 = vmatmul.mubr.msk.f32.gmra.mrb[2].mxu1 %vm803_vm1, %v3962_v39  ;;  %4494 = vmatprep.mubr.msk.f32.mxu0 %vm803_vm1, %v3933_v29  ;;  %v5073_v19 = vpack.c.bf16 %v1866_v18, %v1865_v17  ;;  %v6804_v29 = vmov 0.0  }
  0x5d   : > { %4544 = vmatprep.mubr.msk.f32.mxu1 %vm803_vm1, %v3968_v40 }
  0x5f   : > { %4495 = vmatmul.mubr.msk.f32.vlgmr.msra.gmra.mrb[0].mxu0 %vm803_vm1, %v3934_v32  ;;  %v3977_v32 = vld [vmem:[%s734_s17] ss:$0 sm:$0xff]  ;;  %s6280_s17 = scalar_lea.vmem %s6793_s9, %s6240_s19  ;;  %s3889_s19 = sshll.u32 %s6825_s25, 1 }
  0x60   : > { %4545 = vmatmul.mubr.msk.f32.vlgmr.msra.gmra.mrb[0].mxu1 %vm803_vm1, %v3969_v46  ;;  %4497 = vmatprep.mubr.msk.f32.mxu0 %vm803_vm1, %v3935_v33  ;;  %s6515_s21 = scalar_lea.vmem %s6795_s11, %s3889_s19  ;;  %s6693_s29 = scalar_lea.vmem %s6818_s24, %s3889_s19 }
  0x61   : > { %4547 = vmatprep.mubr.msk.f32.mxu1 %vm803_vm1, %v3970_v47  ;;  %5056 = vmatpush3.bf16.msra.mxu1 %v5055_v48  ;;  %v4012_v47 = vld [vmem:[%s5972_s26 + $0x180] sm:$0xff]  ;;  %v4013_v48 = vld [vmem:[%s5972_s26 + $0x188] sm:$0xff] }
  0x62   : > { %5032 = vmatpush3.bf16.msra.mxu0 %v6000_v49  ;;  %5057 = vmatprep.subr.bf16.mxu1 %v5666_v42  ;;  %v5103_v60 = vpack.c.bf16 %v4013_v48, %v4012_v47  ;;  %v4004_v47 = vld [vmem:[%s5972_s26 + $0x140] sm:$0xff]  ;;  %v4005_v48 = vld [vmem:[%s5972_s26 + $0x148] sm:$0xff] }
  0x63   : > { %5033 = vmatprep.subr.bf16.mxu0 %v5666_v42  ;;  %4498 = vmatmul.mubr.msk.f32.gmra.mrb[2].mxu0 %vm803_vm1, %v3936_v35 }
  0x64   : > { %4548 = vmatmul.mubr.msk.f32.gmra.mrb[2].mxu1 %vm803_vm1, %v3971_v54  ;;  %4582 = vmatprep.mubr.msk.f32.mxu0 %vm5667_vm4, %v6804_v29  ;;  %v3997_v54 = vld [vmem:[%s5972_s26 + $0x108] sm:$0xff] }
  0x65   : > { %5059 = vmatpush3.bf16.msra.mxu1 %v5058_v55  ;;  %4617 = vmatprep.mubr.msk.f32.mxu1 %vm5667_vm4, %v6804_v29  ;;  %v6097_v0 = vpack.c.bf16 %v3997_v54, %v3996_v53  ;;  %v6156_v53 = vpack.c.bf16 %v4005_v48, %v4004_v47  ;;  %v4006_v54 = vld [vmem:[%s5972_s26 + $0x150] sm:$0xff]  ;;  %v2373_v47 = vld [vmem:[%s6246_s16 + $0x8] sm:$0xff]  ;;  %v2372_v48 = vld [vmem:[%s6246_s16] sm:$0xff] }
  0x66   : > { %5035 = vmatpush3.bf16.msra.mxu0 %v6012_v56  ;;  %5060 = vmatprep.subr.bf16.mxu1 %v5666_v42 }
  0x67   : > { %5036 = vmatprep.subr.bf16.mxu0 %v5666_v42 }
  0x69   : > { %5062 = vmatpush3.bf16.msra.mxu1 %v5061_v61 }
  0x6a   : > { %5038 = vmatpush3.bf16.msra.mxu0 %v6023_v62  ;;  %5063 = vmatprep.subr.bf16.mxu1 %v5666_v42 }
  0x6b   : > { %5039 = vmatprep.subr.bf16.mxu0 %v5666_v42 }
  0x6d   : > { %5065 = vmatpush3.bf16.msra.mxu1 %v5064_v3  ;;  %v4014_v3 = vld [vmem:[%s5972_s26 + $0x190] sm:$0xff] }
  0x6e   : > { %5041 = vmatpush3.bf16.msra.mxu0 %v6032_v4  ;;  %5066 = vmatprep.subr.bf16.mxu1 %v5666_v42 }
  0x6f   : > { %5042 = vmatprep.subr.bf16.mxu0 %v5666_v42 }
  0x71   : > { %5068 = vmatpush3.bf16.msra.mxu1 %v5067_v9 }
  0x72   : > { %5044 = vmatpush3.bf16.msra.mxu0 %v6041_v10  ;;  %5069 = vmatprep.subr.bf16.mxu1 %v5666_v42 }
  0x73   : > { %5045 = vmatprep.subr.bf16.mxu0 %v5666_v42 }
  0x75   : > { %5071 = vmatpush3.bf16.msra.mxu1 %v5070_v13  ;;  %v3998_v13 = vld [vmem:[%s5972_s26 + $0x110] sm:$0xff] }
  0x76   : > { %5072 = vmatprep.subr.bf16.mxu1 %v5666_v42  ;;  %5047 = vmatpush3.bf16.msra.mxu0 %v6052_v16 }
  0x77   : > { %5048 = vmatprep.subr.bf16.mxu0 %v5666_v42 }
  0x79   : > { %5074 = vmatpush3.bf16.msra.mxu1 %v5073_v19  ;;  %v5106_v19 = vpack.c.bf16 %v4015_v5, %v4014_v3  ;;  %v4026_v3 = vld [vmem:[%s5972_s26 + $0x1f0] sm:$0xff]  ;;  %v4027_v5 = vld [vmem:[%s5972_s26 + $0x1f8] sm:$0xff] }
  0x7a   : > { %5075 = vmatprep.subr.bf16.mxu1 %v5666_v42  ;;  %5050 = vmatpush3.bf16.msra.mxu0 %v6061_v22 }
  0x7b   : > { %5051 = vmatprep.subr.bf16.mxu0 %v5666_v42 }
  0x7d   : > { %5077 = vmatpush3.bf16.msra.mxu1 %v5076_v25 }
  0x7e   : > { %5102 = vmatprep.subr.bf16.mxu1 %v5666_v42  ;;  %5053 = vmatpush3.bf16.msra.mxu0 %v6070_v28 }
  0x7f   : > { %5078 = vmatprep.subr.bf16.mxu0 %v5666_v42 }
 0x132   : > { %v4496_v30 = vpop.f32.mrb[0].mxu0 }
 0x133   : > { %v4546_v31 = vpop.f32.mrb[0].mxu1  ;;  %v1318_v34 = vpop.f32.mrb[1].mxu0 }
 0x134   : > { %v1813_v33 = vmax.f32 %v4496_v30, %v4546_v31  ;;  %v1789_v35 = vpop.f32.mrb[1].mxu1  ;;  %v6120_v30 = vpack.c.bf16 %v3999_v14, %v3998_v13  ;;  %v4029_v13 = vld [vmem:[%s5972_s26 + $0x208] sm:$0xff] }
 0x135   : > { %v1812_v36 = vmax.f32 %v1318_v34, %v1789_v35  ;;  %v5109_v35 = vpack.c.bf16 %v4017_v24, %v4016_v23  ;;  %v4034_v24 = vld [vmem:[%s5972_s26 + $0x230] sm:$0xff] }
 0x136   : > { %v1824_v37 = vadd.f32 %v3977_v32, %v1813_v33  ;;  %v4499_v40 = vpop.f32.mrb[2].mxu0  ;;  %v4001_v33 = vld [vmem:[%s5972_s26 + $0x128] sm:$0xff] }
 0x137   : > { %v1823_v39 = vadd.f32 %v3977_v32, %v1812_v36  ;;  %v4549_v41 = vpop.f32.mrb[2].mxu1  ;;  %v1328_v45 = vpop.f32.mrb[3].mxu0  ;;  %v4018_v36 = vld [vmem:[%s5972_s26 + $0x1b0] sm:$0xff] }
 0x138   : > { %v1828_v43 = vmax.f32 %v1824_v37, 0.0  ;;  %v1815_v44 = vmax.f32 %v4499_v40, %v4549_v41  ;;  %v1799_v46 = vpop.f32.mrb[3].mxu1  ;;  %v4019_v37 = vld [vmem:[%s5972_s26 + $0x1b8] sm:$0xff]  ;;  %v4002_v40 = vld [vmem:[%s5972_s26 + $0x130] sm:$0xff] }
 0x139   : > { %v1827_v51 = vmax.f32 %v1823_v39, 0.0  ;;  %v1814_v52 = vmax.f32 %v1328_v45, %v1799_v46  ;;  %v4003_v41 = vld [vmem:[%s5972_s26 + $0x138] sm:$0xff]  ;;  %v4021_v45 = vld [vmem:[%s5972_s26 + $0x1c8] sm:$0xff] }
 0x13a   : > { %v1839_v55 = vmul.f32 %v3978_v38, %v1828_v43  ;;  %v1826_v57 = vadd.f32 %v3977_v32, %v1815_v44  ;;  %v5112_v43 = vpack.c.bf16 %v4019_v37, %v4018_v36  ;;  %v4020_v44 = vld [vmem:[%s5972_s26 + $0x1c0] sm:$0xff]  ;;  %v6147_v46 = vpack.c.bf16 %v4003_v41, %v4002_v40  ;;  %v4041_v40 = vld [vmem:[%s5972_s26 + $0x268] sm:$0xff] }
 0x13b   : > { %v1838_v58 = vmul.f32 %v3978_v38, %v1827_v51  ;;  %v1825_v59 = vadd.f32 %v3977_v32, %v1814_v52  ;;  %v4000_v32 = vld [vmem:[%s5972_s26 + $0x120] sm:$0xff]  ;;  %v4022_v51 = vld [vmem:[%s5972_s26 + $0x1d0] sm:$0xff]  ;;  %v4023_v52 = vld [vmem:[%s5972_s26 + $0x1d8] sm:$0xff] }
 0x13c   : > { %v6095_v61 = vadd.f32 %v3979_v50, %v1839_v55  ;;  %v1830_v63 = vmax.f32 %v1826_v57, 0.0  ;;  %v6138_v39 = vpack.c.bf16 %v4001_v33, %v4000_v32  ;;  %v4007_v55 = vld [vmem:[%s5972_s26 + $0x158] sm:$0xff]  ;;  %v5118_v57 = vpack.c.bf16 %v4023_v52, %v4022_v51  ;;  %v4037_v32 = vld [vmem:[%s5972_s26 + $0x248] sm:$0xff]  ;;  %v4040_v37 = vld [vmem:[%s5972_s26 + $0x260] sm:$0xff] }
 0x13d   : > { %v1849_v1 = vadd.f32 %v3979_v50, %v1838_v58  ;;  %v1829_v2 = vmax.f32 %v1825_v59, 0.0  ;;  %v4024_v58 = vld [vmem:[%s5972_s26 + $0x1e0] sm:$0xff]  ;;  %v4025_v59 = vld [vmem:[%s5972_s26 + $0x1e8] sm:$0xff]  ;;  %v6228_v41 = vpack.c.bf16 %v4041_v40, %v4040_v37  ;;  %v2374_v51 = vld [vmem:[%s6246_s16 + $0x10] sm:$0xff] }
 0x13e   : > { %v1841_v6 = vmul.f32 %v3978_v38, %v1830_v63  ;;  %v2142_v7 = vrot.slane %v6095_v61, 3  ;;  %v2049_v8 = vrot.slane %v6095_v61, 2  ;;  %v2235_v9 = vrot.slane %v6095_v61, 4  ;;  %v4008_v63 = vld [vmem:[%s5972_s26 + $0x160] sm:$0xff]  ;;  %v2377_v52 = vld [vmem:[%s6246_s16 + $0x28] sm:$0xff]  ;;  %v2395_v37 = vld [vmem:[%s6246_s16 + $0xb8] sm:$0xff] }
 0x13f   : > { %v1840_v11 = vmul.f32 %v3978_v38, %v1829_v2  ;;  %4618 = vmatmul.mubr.f32.vlgmr.msra.gmra.mrb[4].mxu1 %v1849_v1  ;;  %v1887_v12 = vrot.slane %v1849_v1, 1  ;;  %v2141_v15 = vrot.slane %v1849_v1, 3  ;;  %v2048_v17 = vrot.slane %v1849_v1, 2 }
 0x140   : > { %v1852_v18 = vadd.f32 %v3979_v50, %v1841_v6  ;;  %5104 = vmatpush3.bf16.msra.mxu1 %v5103_v60  ;;  %4687 = vmatprep.mubr.msk.f32.mxu1 %vm5667_vm4, %v6804_v29  ;;  %v2234_v20 = vrot.slane %v1849_v1, 4  ;;  %v6165_v60 = vpack.c.bf16 %v4007_v55, %v4006_v54  ;;  %v4009_v1 = vld [vmem:[%s5972_s26 + $0x168] sm:$0xff]  ;;  %v5121_v2 = vpack.c.bf16 %v4025_v59, %v4024_v58  ;;  %v2379_v54 = vld [vmem:[%s6246_s16 + $0x38] sm:$0xff]  ;;  %v2376_v58 = vld [vmem:[%s6246_s16 + $0x20] sm:$0xff] }
 0x141   : > { %v6108_v21 = vadd.f32 %v3979_v50, %v1840_v11  ;;  %4583 = vmatmul.mubr.f32.vlgmr.msra.gmra.mrb[4].mxu0 %v1887_v12  ;;  %5105 = vmatprep.subr.bf16.mxu1 %v5666_v42  ;;  %v6114_v25 = vsel %vm2140_vm5, %v2141_v15, %v2142_v7  ;;  %v6117_v26 = vsel %vm2047_vm6, %v2048_v17, %v2049_v8  ;;  %v4010_v7 = vld [vmem:[%s5972_s26 + $0x170] sm:$0xff]  ;;  %v4011_v8 = vld [vmem:[%s5972_s26 + $0x178] sm:$0xff]  ;;  %v4028_v12 = vld [vmem:[%s5972_s26 + $0x200] sm:$0xff] }
 0x142   : > { %v3134_v27 = vrot.slane %v1852_v18, 2  ;;  %5080 = vmatpush3.bf16.msra.mxu0 %v6097_v0  ;;  %4652 = vmatprep.mubr.msk.f32.mxu0 %vm5667_vm4, %v6804_v29  ;;  %v6125_v31 = vsel %vm2233_vm7, %v2234_v20, %v2235_v9  ;;  %v5115_v50 = vpack.c.bf16 %v4021_v45, %v4020_v44  ;;  %v6174_v6 = vpack.c.bf16 %v4009_v1, %v4008_v63  ;;  %v4030_v15 = vld [vmem:[%s5972_s26 + $0x210] sm:$0xff]  ;;  %v4031_v17 = vld [vmem:[%s5972_s26 + $0x218] sm:$0xff]  ;;  %v4033_v20 = vld [vmem:[%s5972_s26 + $0x228] sm:$0xff] }
 0x143   : > { %5081 = vmatprep.subr.bf16.mxu0 %v5666_v42  ;;  %v3133_v34 = vrot.slane %v6108_v21, 2  ;;  %v5124_v9 = vpack.c.bf16 %v4027_v5, %v4026_v3  ;;  %v6181_v11 = vpack.c.bf16 %v4011_v8, %v4010_v7  ;;  %v6187_v14 = vpack.c.bf16 %v4029_v13, %v4028_v12  ;;  %v4043_v44 = vld [vmem:[%s5972_s26 + $0x278] sm:$0xff]  ;;  %v2378_v59 = vld [vmem:[%s6246_s16 + $0x30] sm:$0xff]  ;;  %v2381_v63 = vld [vmem:[%s6246_s16 + $0x48] sm:$0xff] }
 0x144   : > { %5107 = vmatpush3.bf16.msra.mxu1 %v5106_v19  ;;  %v6196_v18 = vpack.c.bf16 %v4031_v17, %v4030_v15  ;;  %v4032_v19 = vld [vmem:[%s5972_s26 + $0x220] sm:$0xff]  ;;  %v5152_v55 = vpack.c.bf16 %v2374_v51, %v2372_v48  ;;  %v2383_v1 = vld [vmem:[%s6246_s16 + $0x58] sm:$0xff]  ;;  %v2382_v7 = vld [vmem:[%s6246_s16 + $0x50] sm:$0xff] }
 0x145   : > { %5108 = vmatprep.subr.bf16.mxu1 %v5666_v42  ;;  %v6135_v38 = vsel %vm2047_vm6, %v3133_v34, %v3134_v27  ;;  %v6204_v23 = vpack.c.bf16 %v4033_v20, %v4032_v19  ;;  %v4036_v27 = vld [vmem:[%s5972_s26 + $0x240] sm:$0xff]  ;;  %v4038_v34 = vld [vmem:[%s5972_s26 + $0x250] sm:$0xff]  ;;  %v5158_v3 = vpack.c.bf16 %v2383_v1, %v2381_v63  ;;  %v2385_v8 = vld [vmem:[%s6246_s16 + $0x68] sm:$0xff] }
 0x146   : > { %5083 = vmatpush3.bf16.msra.mxu0 %v6120_v30  ;;  %v6216_v33 = vpack.c.bf16 %v4037_v32, %v4036_v27  ;;  %v2380_v5 = vld [vmem:[%s6246_s16 + $0x40] sm:$0xff]  ;;  %v2386_v17 = vld [vmem:[%s6246_s16 + $0x70] sm:$0xff]  ;;  %v2389_v20 = vld [vmem:[%s6246_s16 + $0x88] sm:$0xff] }
 0x147   : > { %5084 = vmatprep.subr.bf16.mxu0 %v5666_v42  ;;  %v5160_v12 = vpack.c.bf16 %v2382_v7, %v2380_v5  ;;  %v2384_v15 = vld [vmem:[%s6246_s16 + $0x60] sm:$0xff]  ;;  %v2390_v32 = vld [vmem:[%s6246_s16 + $0x90] sm:$0xff]  ;;  %v2399_v48 = vld [vmem:[%s6246_s16 + $0xd8] sm:$0xff] }
 0x148   : > { %5110 = vmatpush3.bf16.msra.mxu1 %v5109_v35  ;;  %v4039_v35 = vld [vmem:[%s5972_s26 + $0x258] sm:$0xff]  ;;  %v5164_v19 = vpack.c.bf16 %v2386_v17, %v2384_v15  ;;  %v2388_v27 = vld [vmem:[%s6246_s16 + $0x80] sm:$0xff]  ;;  %v2402_v63 = vld [vmem:[%s6246_s16 + $0xf0] sm:$0xff] }
 0x149   : > { %5111 = vmatprep.subr.bf16.mxu1 %v5666_v42  ;;  %v6222_v36 = vpack.c.bf16 %v4039_v35, %v4038_v34  ;;  %v5168_v34 = vpack.c.bf16 %v2390_v32, %v2388_v27  ;;  %v2393_v35 = vld [vmem:[%s6246_s16 + $0xa8] sm:$0xff]  ;;  %v2396_v51 = vld [vmem:[%s6246_s16 + $0xc0] sm:$0xff]  ;;  %v2327_v27 = vlaneseq }
 0x14a   : > { %5086 = vmatpush3.bf16.msra.mxu0 %v6138_v39  ;;  %v5170_v40 = vpack.c.bf16 %v2395_v37, %v2393_v35  ;;  %v4044_v35 = vld [vmem:[%s6292_s23] ss:$0 sm:$0xff] }
 0x14b   : > { %5087 = vmatprep.subr.bf16.mxu0 %v5666_v42  ;;  %v6294_v32 = vshrl.u32 %v2327_v27, 7  ;;  %v2566_v27 = vld [vmem:[%s6333_s28 + $0x8] sm:$0xff] }
 0x14c   : > { %5113 = vmatpush3.bf16.msra.mxu1 %v5112_v43  ;;  %v4042_v43 = vld [vmem:[%s5972_s26 + $0x270] sm:$0xff] }
 0x14d   : > { %5114 = vmatprep.subr.bf16.mxu1 %v5666_v42  ;;  %v6234_v45 = vpack.c.bf16 %v4043_v44, %v4042_v43  ;;  %v2392_v43 = vld [vmem:[%s6246_s16 + $0xa0] sm:$0xff]  ;;  %v2394_v44 = vld [vmem:[%s6246_s16 + $0xb0] sm:$0xff] }
 0x14e   : > { %5089 = vmatpush3.bf16.msra.mxu0 %v6147_v46 }
 0x14f   : > { %5090 = vmatprep.subr.bf16.mxu0 %v5666_v42 }
 0x150   : > { %5116 = vmatpush3.bf16.msra.mxu1 %v5115_v50 }
 0x151   : > { %5117 = vmatprep.subr.bf16.mxu1 %v5666_v42 }
 0x152   : > { %5092 = vmatpush3.bf16.msra.mxu0 %v6156_v53 }
 0x153   : > { %5093 = vmatprep.subr.bf16.mxu0 %v5666_v42 }
 0x154   : > { %5119 = vmatpush3.bf16.msra.mxu1 %v5118_v57  ;;  %v5154_v57 = vpack.c.bf16 %v2379_v54, %v2377_v52  ;;  %v2398_v52 = vld [vmem:[%s6246_s16 + $0xd0] sm:$0xff] }
 0x155   : > { %5120 = vmatprep.subr.bf16.mxu1 %v5666_v42  ;;  %v5176_v54 = vpack.c.bf16 %v2398_v52, %v2396_v51 }
 0x156   : > { %5095 = vmatpush3.bf16.msra.mxu0 %v6165_v60 }
 0x157   : > { %5096 = vmatprep.subr.bf16.mxu0 %v5666_v42 }
 0x158   : > { %5122 = vmatpush3.bf16.msra.mxu1 %v5121_v2  ;;  %v5156_v2 = vpack.c.bf16 %v2378_v59, %v2376_v58  ;;  %v2400_v59 = vld [vmem:[%s6246_s16 + $0xe0] sm:$0xff] }
 0x159   : > { %5123 = vmatprep.subr.bf16.mxu1 %v5666_v42  ;;  %v5180_v1 = vpack.c.bf16 %v2402_v63, %v2400_v59  ;;  %v2345_v59 = vld [vmem:[%s6280_s17 + $0x28] sm:$0xff]  ;;  %v2347_v63 = vld [vmem:[%s6280_s17 + $0x38] sm:$0xff] }
 0x15a   : > { %5098 = vmatpush3.bf16.msra.mxu0 %v6174_v6 }
 0x15b   : > { %5099 = vmatprep.subr.bf16.mxu0 %v5666_v42 }
 0x15c   : > { %5125 = vmatpush3.bf16.msra.mxu1 %v5124_v9  ;;  %v2387_v9 = vld [vmem:[%s6246_s16 + $0x78] sm:$0xff] }
 0x15d   : > { %v5162_v13 = vpack.c.bf16 %v2387_v9, %v2385_v8 }
 0x15e   : > { %5101 = vmatpush3.bf16.msra.mxu0 %v6181_v11 }
 0x15f   : > { %4688 = vmatmul.mubr.f32.vlgmr.msra.gmra.mrb[6].mxu1 %v6114_v25  ;;  %5126 = vmatprep.subr.bf16.mxu0 %v5666_v42  ;;  %v4035_v25 = vld [vmem:[%s5972_s26 + $0x238] sm:$0xff] }
 0x160   : > { %2471 = vmatprep.mubr.f32.mxu1 %v6804_v29 }
 0x161   : > { %4653 = vmatmul.mubr.f32.vlgmr.msra.gmra.mrb[6].mxu0 %v6117_v26  ;;  %v6210_v26 = vpack.c.bf16 %v4035_v25, %v4034_v24  ;;  %v2391_v24 = vld [vmem:[%s6246_s16 + $0x98] sm:$0xff] }
 0x162   : > { %5128 = vmatpush3.bf16.msra.mxu0 %v6187_v14  ;;  %4722 = vmatprep.mubr.msk.f32.mxu0 %vm5667_vm4, %v6804_v29  ;;  %v5166_v25 = vpack.c.bf16 %v2391_v24, %v2389_v20 }
 0x163   : > { %5129 = vmatprep.subr.bf16.mxu0 %v5666_v42 }
 0x166   : > { %5131 = vmatpush3.bf16.msra.mxu0 %v6196_v18 }
 0x167   : > { %5132 = vmatprep.subr.bf16.mxu0 %v5666_v42 }
 0x16a   : > { %5134 = vmatpush3.bf16.msra.mxu0 %v6204_v23 }
 0x16b   : > { %5135 = vmatprep.subr.bf16.mxu0 %v5666_v42 }
 0x16e   : > { %5137 = vmatpush3.bf16.msra.mxu0 %v6210_v26 }
 0x16f   : > { %5138 = vmatprep.subr.bf16.mxu0 %v5666_v42 }
 0x172   : > { %5140 = vmatpush3.bf16.msra.mxu0 %v6216_v33 }
 0x173   : > { %5141 = vmatprep.subr.bf16.mxu0 %v5666_v42 }
 0x176   : > { %5143 = vmatpush3.bf16.msra.mxu0 %v6222_v36 }
 0x177   : > { %5144 = vmatprep.subr.bf16.mxu0 %v5666_v42 }
 0x17a   : > { %5146 = vmatpush3.bf16.msra.mxu0 %v6228_v41 }
 0x17b   : > { %5147 = vmatprep.subr.bf16.mxu0 %v5666_v42 }
 0x17e   : > { %5149 = vmatpush3.bf16.msra.mxu0 %v6234_v45 }
 0x181   : > { %4723 = vmatmul.mubr.f32.vlgmr.msra.gmra.mrb[8].mxu0 %v6125_v31  ;;  %v2375_v31 = vld [vmem:[%s6246_s16 + $0x18] sm:$0xff] }
 0x182   : > { %v5150_v50 = vpack.c.bf16 %v2375_v31, %v2373_v47  ;;  %v5172_v47 = vpack.c.bf16 %v2394_v44, %v2392_v43  ;;  %v2397_v31 = vld [vmem:[%s6246_s16 + $0xc8] sm:$0xff]  ;;  %v6304_v44 = vsub.s32 0, %v6294_v32 }
 0x184   : > { %5151 = vmatprep.subr.bf16.mxu1 %v5150_v50  ;;  %v5174_v50 = vpack.c.bf16 %v2399_v48, %v2397_v31  ;;  %v6316_v48 = vld [vmem:[%s6310_s20] sm:$0x1] }
 0x185   : > { %5153 = vmatpush1.bf16.msra.mxu1 %v5152_v55  ;;  %v2401_v55 = vld [vmem:[%s6246_s16 + $0xe8] sm:$0xff] }
 0x186   : > { %5155 = vmatprep.subr.bf16.mxu1 %v5154_v57  ;;  %v2403_v57 = vld [vmem:[%s6246_s16 + $0xf8] sm:$0xff] }
 0x187   : > { %v5178_v58 = vpack.c.bf16 %v2403_v57, %v2401_v55  ;;  %v2340_v57 = vld [vmem:[%s6280_s17] sm:$0xff] }
 0x189   : > { %5157 = vmatpush1.bf16.msra.mxu1 %v5156_v2  ;;  %v2341_v2 = vld [vmem:[%s6280_s17 + $0x8] sm:$0xff] }
 0x18a   : > { %5159 = vmatprep.subr.bf16.mxu1 %v5158_v3  ;;  %v2343_v3 = vld [vmem:[%s6280_s17 + $0x18] sm:$0xff] }
 0x18b   : > { %v5182_v5 = vpack.c.bf16 %v2343_v3, %v2341_v2 }
 0x18d   : > { %5161 = vmatpush1.bf16.msra.mxu1 %v5160_v12 }
 0x18e   : > { %5163 = vmatprep.subr.bf16.mxu1 %v5162_v13 }
 0x191   : > { %5165 = vmatpush1.bf16.msra.mxu1 %v5164_v19 }
 0x192   : > { %5167 = vmatprep.subr.bf16.mxu1 %v5166_v25 }
 0x195   : > { %5169 = vmatpush1.bf16.msra.mxu1 %v5168_v34 }
 0x196   : > { %5171 = vmatprep.subr.bf16.mxu1 %v5170_v40 }
 0x199   : > { %5173 = vmatpush1.bf16.msra.mxu1 %v5172_v47  ;;  %v6313_v47 = vld [vmem:[%s6301_s30] sm:$0x1] }
 0x19a   : > { %5175 = vmatprep.subr.bf16.mxu1 %v5174_v50  ;;  %v2330_v51 = vrot.slane %v6313_v47, %v6304_v44 }
 0x19d   : > { %5177 = vmatpush1.bf16.msra.mxu1 %v5176_v54  ;;  %v2337_v54 = vrot.slane %v6316_v48, %v6304_v44 }
 0x19e   : > { %5179 = vmatprep.subr.bf16.mxu1 %v5178_v58  ;;  %v2342_v58 = vld [vmem:[%s6280_s17 + $0x10] sm:$0xff] }
 0x19f   : > { %v5184_v2 = vpack.c.bf16 %v2342_v58, %v2340_v57  ;;  %v2586_v57 = vld [vmem:[%s6333_s28 + $0xa8] sm:$0xff] }
 0x1a1   : > { %5181 = vmatpush1.bf16.msra.mxu1 %v5180_v1 }
 0x1a2   : > { %5183 = vmatprep.subr.bf16.mxu1 %v5182_v5  ;;  %v5186_v5 = vpack.c.bf16 %v2347_v63, %v2345_v59  ;;  %v2352_v63 = vld [vmem:[%s6280_s17 + $0x60] sm:$0xff] }
 0x212   : > { %v2025_v7 = vpop.f32.mrb[4].mxu1 }
 0x213   : > { %v4619_v8 = vpop.f32.mrb[5].mxu1 }
 0x214   : > { %v1955_v9 = vpop.f32.mrb[4].mxu0  ;;  %v2346_v8 = vld [vmem:[%s6280_s17 + $0x30] sm:$0xff] }
 0x215   : > { %v2026_v12 = vadd.f32 %v2025_v7, %v1955_v9  ;;  %v4584_v13 = vpop.f32.mrb[5].mxu0  ;;  %v2344_v7 = vld [vmem:[%s6280_s17 + $0x20] sm:$0xff]  ;;  %v2349_v9 = vld [vmem:[%s6280_s17 + $0x48] sm:$0xff] }
 0x216   : > { %v2348_v13 = vld [vmem:[%s6280_s17 + $0x40] sm:$0xff] }
 0x232   : > { %v2211_v15 = vpop.f32.mrb[6].mxu1 }
 0x233   : > { %v4689_v17 = vpop.f32.mrb[7].mxu1 }
 0x234   : > { %v2118_v19 = vpop.f32.mrb[6].mxu0  ;;  %v2581_v17 = vld [vmem:[%s6333_s28 + $0x80] sm:$0xff] }
 0x235   : > { %v2122_v20 = vadd.f32 %v2118_v19, %v2026_v12  ;;  %v4654_v24 = vpop.f32.mrb[7].mxu0  ;;  %v2351_v12 = vld [vmem:[%s6280_s17 + $0x58] sm:$0xff]  ;;  %v2582_v19 = vld [vmem:[%s6333_s28 + $0x88] sm:$0xff] }
 0x236   : > { %v5188_v24 = vpack.c.bf16 %v2346_v8, %v2344_v7  ;;  %v2354_v7 = vld [vmem:[%s6280_s17 + $0x70] sm:$0xff] }
 0x237   : > { %v2215_v25 = vadd.f32 %v2211_v15, %v2122_v20  ;;  %v2350_v15 = vld [vmem:[%s6280_s17 + $0x50] sm:$0xff]  ;;  %v2565_v20 = vld [vmem:[%s6333_s28] sm:$0xff] }
 0x238   : > { %v5192_v59 = vpack.c.bf16 %v2350_v15, %v2348_v13  ;;  %v2587_v8 = vld [vmem:[%s6333_s28 + $0xb0] sm:$0xff]  ;;  %v2359_v13 = vld [vmem:[%s6280_s17 + $0x98] sm:$0xff] }
 0x254   : > { %v2304_v34 = vpop.f32.mrb[8].mxu0 }
 0x255   : > { %v2308_v37 = vadd.f32 %v2304_v34, %v2215_v25  ;;  %v4724_v40 = vpop.f32.mrb[9].mxu0  ;;  %v6345_v25 = vpack.c.bf16 %v2582_v19, %v2581_v17  ;;  %v2583_v34 = vld [vmem:[%s6333_s28 + $0x90] sm:$0xff]  ;;  %v5196_v17 = vpack.c.bf16 %v2354_v7, %v2352_v63  ;;  %v2356_v19 = vld [vmem:[%s6280_s17 + $0x80] sm:$0xff] }
 0x256   : > { %v6350_v40 = vpack.c.bf16 %v2566_v27, %v2565_v20  ;;  %v2572_v27 = vld [vmem:[%s6333_s28 + $0x38] sm:$0xff]  ;;  %v2573_v63 = vld [vmem:[%s6333_s28 + $0x40] sm:$0xff]  ;;  %v2591_v7 = vld [vmem:[%s6333_s28 + $0xd0] sm:$0xff] }
 0x257   : > { %v2316_v43 = vadd.f32 %v4044_v35, %v2308_v37  ;;  %v2584_v35 = vld [vmem:[%s6333_s28 + $0x98] sm:$0xff]  ;;  %v5190_v37 = vpack.c.bf16 %v2351_v12, %v2349_v9  ;;  %5215 = vmatprep.subr.bf16.mxu0 %v6345_v25  ;;  %v2357_v12 = vld [vmem:[%s6280_s17 + $0x88] sm:$0xff] }
 0x258   : > { %5217 = vmatpush3.bf16.msra.mxu0 %v6350_v40  ;;  %v2588_v9 = vld [vmem:[%s6333_s28 + $0xb8] sm:$0xff] }
 0x259   : > { %v2317_v31 = vmax.f32 %v2316_v43, 0.0  ;;  %v6352_v43 = vpack.c.bf16 %v2584_v35, %v2583_v34  ;;  %v6380_v20 = vpack.c.bf16 %v2588_v9, %v2587_v8  ;;  %v5198_v34 = vpack.c.bf16 %v2359_v13, %v2357_v12  ;;  %v2358_v35 = vld [vmem:[%s6280_s17 + $0x90] sm:$0xff]  ;;  %v2592_v8 = vld [vmem:[%s6333_s28 + $0xd8] sm:$0xff]  ;;  %v2365_v9 = vld [vmem:[%s6280_s17 + $0xc8] sm:$0xff] }
 0x25a   : > { %v2367_v12 = vld [vmem:[%s6280_s17 + $0xd8] sm:$0xff] }
 0x25b   : > { %v2319_v50 = vrot.slane %v2317_v31, 2  ;;  %5219 = vmatprep.subr.bf16.mxu0 %v6352_v43 }
 0x25d   : > { %v6320_v52 = vmax.f32 %v2317_v31, %v2319_v50  ;;  %v2567_v31 = vld [vmem:[%s6333_s28 + $0x10] sm:$0xff]  ;;  %v2568_v50 = vld [vmem:[%s6333_s28 + $0x18] sm:$0xff] }
 0x25e   : > { %v6362_v58 = vpack.c.bf16 %v2568_v50, %v2567_v31  ;;  %v2590_v31 = vld [vmem:[%s6333_s28 + $0xc8] sm:$0xff] }
 0x25f   : > { %v2332_v55 = vmul.f32 %v2330_v51, %v6320_v52  ;;  %v2585_v51 = vld [vmem:[%s6333_s28 + $0xa0] sm:$0xff]  ;;  %v2361_v50 = vld [vmem:[%s6280_s17 + $0xa8] sm:$0xff] }
 0x260   : > { %5221 = vmatpush3.bf16.msra.mxu0 %v6362_v58 }
 0x261   : > { %v2339_v1 = vadd.f32 %v2337_v54, %v2332_v55  ;;  %v2353_v54 = vld [vmem:[%s6280_s17 + $0x68] sm:$0xff]  ;;  %v2355_v55 = vld [vmem:[%s6280_s17 + $0x78] sm:$0xff] }
 0x263   : > { %v2405_v3 = vrot.slane %v2339_v1, 4  ;;  %v6366_v1 = vpack.c.bf16 %v2586_v57, %v2585_v51  ;;  %v2363_v51 = vld [vmem:[%s6280_s17 + $0xb8] sm:$0xff]  ;;  %v2360_v57 = vld [vmem:[%s6280_s17 + $0xa0] sm:$0xff] }
 0x265   : > { %2472 = vmatmul.mubr.f32.vlgmr.msra.gmra.mrb[8].mxu1 %v2405_v3  ;;  %v2570_v3 = vld [vmem:[%s6333_s28 + $0x28] sm:$0xff]  ;;  %5223 = vmatprep.subr.bf16.mxu0 %v6366_v1 }
 0x266   : > { %5185 = vmatpush1.bf16.msra.mxu1 %v5184_v2  ;;  %2542 = vmatprep.mubr.f32.mxu1 %v6804_v29  ;;  %v2569_v2 = vld [vmem:[%s6333_s28 + $0x20] sm:$0xff]  ;;  %v2371_v29 = vld [vmem:[%s6280_s17 + $0xf8] sm:$0xff] }
 0x267   : > { %5187 = vmatprep.subr.bf16.mxu1 %v5186_v5  ;;  %v5194_v5 = vpack.c.bf16 %v2355_v55, %v2353_v54  ;;  %v6376_v15 = vpack.c.bf16 %v2570_v3, %v2569_v2  ;;  %v5200_v55 = vpack.c.bf16 %v2358_v35, %v2356_v19  ;;  %v2574_v2 = vld [vmem:[%s6333_s28 + $0x48] sm:$0xff]  ;;  %v5202_v3 = vpack.c.bf16 %v2363_v51, %v2361_v50  ;;  %v2364_v19 = vld [vmem:[%s6280_s17 + $0xc0] sm:$0xff] }
 0x268   : > { %v6404_v13 = vpack.c.bf16 %v2574_v2, %v2573_v63  ;;  %v5206_v35 = vpack.c.bf16 %v2367_v12, %v2365_v9  ;;  %v2594_v50 = vld [vmem:[%s6333_s28 + $0xe8] sm:$0xff] }
 0x269   : > { %5225 = vmatpush3.bf16.msra.mxu0 %v6376_v15  ;;  %v2369_v51 = vld [vmem:[%s6280_s17 + $0xe8] sm:$0xff] }
 0x26a   : > { %5189 = vmatpush1.bf16.msra.mxu1 %v5188_v24  ;;  %v2571_v24 = vld [vmem:[%s6333_s28 + $0x30] sm:$0xff]  ;;  %5227 = vmatprep.subr.bf16.mxu0 %v6380_v20  ;;  %v5210_v2 = vpack.c.bf16 %v2371_v29, %v2369_v51  ;;  %v6817_v29 = vmov 0.0  }
 0x26b   : > { %5191 = vmatprep.subr.bf16.mxu1 %v5190_v37  ;;  %v2589_v37 = vld [vmem:[%s6333_s28 + $0xc0] sm:$0xff]  ;;  %v6390_v54 = vpack.c.bf16 %v2572_v27, %v2571_v24  ;;  %v6408_v24 = vpack.c.bf16 %v2592_v8, %v2591_v7  ;;  %v2575_v27 = vld [vmem:[%s6333_s28 + $0x50] sm:$0xff]  ;;  %v2323_v8 = vmul.f32 %v6313_v47, %v6320_v52 }
 0x26d   : > { %5229 = vmatpush3.bf16.msra.mxu0 %v6390_v54  ;;  %v2325_v9 = vadd.f32 %v6316_v48, %v2323_v8  ;;  %v2758_v8 = vld [vmem:[%s5972_s26] sm:$0xff] }
 0x26e   : > { %5193 = vmatpush1.bf16.msra.mxu1 %v5192_v59  ;;  %v6394_v59 = vpack.c.bf16 %v2590_v31, %v2589_v37  ;;  %v2366_v37 = vld [vmem:[%s6280_s17 + $0xd0] sm:$0xff]  ;;  %v2593_v31 = vld [vmem:[%s6333_s28 + $0xe0] sm:$0xff] }
 0x26f   : > { %5195 = vmatprep.subr.bf16.mxu1 %v5194_v5  ;;  %v2362_v5 = vld [vmem:[%s6280_s17 + $0xb0] sm:$0xff]  ;;  %v6421_v63 = vpack.c.bf16 %v2594_v50, %v2593_v31 }
 0x270   : > { %5231 = vmatprep.subr.bf16.mxu0 %v6394_v59 }
 0x271   : > { %5233 = vmatpush3.bf16.msra.mxu0 %v6404_v13 }
 0x272   : > { %5197 = vmatpush1.bf16.msra.mxu1 %v5196_v17  ;;  %v5204_v17 = vpack.c.bf16 %v2362_v5, %v2360_v57  ;;  %v5208_v57 = vpack.c.bf16 %v2366_v37, %v2364_v19  ;;  %5235 = vmatprep.subr.bf16.mxu0 %v6408_v24  ;;  %v2370_v5 = vld [vmem:[%s6280_s17 + $0xf0] sm:$0xff] }
 0x273   : > { %5199 = vmatprep.subr.bf16.mxu1 %v5198_v34  ;;  %v2576_v34 = vld [vmem:[%s6333_s28 + $0x58] sm:$0xff] }
 0x276   : > { %5201 = vmatpush1.bf16.msra.mxu1 %v5200_v55  ;;  %v6418_v55 = vpack.c.bf16 %v2576_v34, %v2575_v27 }
 0x277   : > { %5203 = vmatprep.subr.bf16.mxu1 %v5202_v3  ;;  %v2368_v3 = vld [vmem:[%s6280_s17 + $0xe0] sm:$0xff] }
 0x278   : > { %5237 = vmatpush3.bf16.msra.mxu0 %v6418_v55  ;;  %v5212_v7 = vpack.c.bf16 %v2370_v5, %v2368_v3 }
 0x279   : > { %5239 = vmatprep.subr.bf16.mxu0 %v6421_v63 }
 0x27a   : > { %5205 = vmatpush1.bf16.msra.mxu1 %v5204_v17 }
 0x27b   : > { %5207 = vmatprep.subr.bf16.mxu1 %v5206_v35 }
 0x27e   : > { %5209 = vmatpush1.bf16.msra.mxu1 %v5208_v57 }
 0x27f   : > { %5211 = vmatprep.subr.bf16.mxu1 %v5210_v2 }
 0x282   : > { %5213 = vmatpush1.bf16.msra.mxu1 %v5212_v7 }
 0x283   : > { %5270 = vmatprep.subr.bf16.mxu1 %v5666_v42 }
 0x285   : > { %2543 = vmatmul.mubr.f32.vlgmr.msra.gmra.mrb[8].mxu1 %v2325_v9  ;;  %v2759_v9 = vld [vmem:[%s5972_s26 + $0x8] sm:$0xff] }
 0x286   : > { %5272 = vmatpush3.bf16.msra.mxu1 %v6000_v49  ;;  %4792 = vmatprep.mubr.msk.f32.mxu1 %vm5667_vm4, %v6817_v29  ;;  %v2793_v49 = vrot.slane %v6108_v21, 7 }
 0x287   : > { %5273 = vmatprep.subr.bf16.mxu1 %v5666_v42 }
 0x28a   : > { %5275 = vmatpush3.bf16.msra.mxu1 %v6012_v56  ;;  %v2792_v56 = vrot.slane %v6095_v61, 7 }
 0x28b   : > { %5276 = vmatprep.subr.bf16.mxu1 %v5666_v42 }
 0x28e   : > { %5278 = vmatpush3.bf16.msra.mxu1 %v6023_v62  ;;  %v2794_v62 = vsel %vm2791_vm8, %v2792_v56, %v2793_v49  ;;  %v5295_v56 = vpack.c.bf16 %v2759_v9, %v2758_v8  ;;  %v4089_v8 = vld [vmem:[%s5972_s26 + $0x1e0] sm:$0xff]  ;;  %v4090_v9 = vld [vmem:[%s5972_s26 + $0x1e8] sm:$0xff] }
 0x28f   : > { %5279 = vmatprep.subr.bf16.mxu1 %v5666_v42 }
 0x292   : > { %5281 = vmatpush3.bf16.msra.mxu1 %v6032_v4  ;;  %v2577_v4 = vld [vmem:[%s6333_s28 + $0x60] sm:$0xff] }
 0x293   : > { %5282 = vmatprep.subr.bf16.mxu1 %v5666_v42 }
 0x296   : > { %5284 = vmatpush3.bf16.msra.mxu1 %v6041_v10  ;;  %v2578_v10 = vld [vmem:[%s6333_s28 + $0x68] sm:$0xff] }
 0x297   : > { %5285 = vmatprep.subr.bf16.mxu1 %v5666_v42 }
 0x29a   : > { %5287 = vmatpush3.bf16.msra.mxu1 %v6052_v16  ;;  %v5240_v16 = vpack.c.bf16 %v2578_v10, %v2577_v4  ;;  %v2760_v4 = vld [vmem:[%s5972_s26 + $0x10] sm:$0xff]  ;;  %v2761_v10 = vld [vmem:[%s5972_s26 + $0x18] sm:$0xff] }
 0x29b   : > { %5288 = vmatprep.subr.bf16.mxu1 %v5666_v42 }
 0x29c   : > { %5241 = vmatpush3.bf16.msra.mxu0 %v5240_v16 }
 0x29e   : > { %5290 = vmatpush3.bf16.msra.mxu1 %v6061_v22  ;;  %v2595_v22 = vld [vmem:[%s6333_s28 + $0xf0] sm:$0xff] }
 0x29f   : > { %5291 = vmatprep.subr.bf16.mxu1 %v5666_v42 }
 0x2a2   : > { %5293 = vmatpush3.bf16.msra.mxu1 %v6070_v28  ;;  %v2596_v28 = vld [vmem:[%s6333_s28 + $0xf8] sm:$0xff] }
 0x2a3   : > { %5318 = vmatprep.subr.bf16.mxu1 %v5666_v42 }
 0x2a5   : > { %4793 = vmatmul.mubr.f32.vlgmr.msra.gmra.mrb[10].mxu1 %v2794_v62 }
 0x2a6   : > { %5320 = vmatpush3.bf16.msra.mxu1 %v6097_v0  ;;  %4862 = vmatprep.mubr.msk.f32.mxu1 %vm5667_vm4, %v6817_v29  ;;  %v5242_v0 = vpack.c.bf16 %v2596_v28, %v2595_v22  ;;  %v2762_v22 = vld [vmem:[%s5972_s26 + $0x20] sm:$0xff]  ;;  %v2763_v28 = vld [vmem:[%s5972_s26 + $0x28] sm:$0xff] }
 0x2a7   : > { %5321 = vmatprep.subr.bf16.mxu1 %v5666_v42 }
 0x2a8   : > { %5243 = vmatprep.subr.bf16.mxu0 %v5242_v0 }
 0x2aa   : > { %5323 = vmatpush3.bf16.msra.mxu1 %v6120_v30  ;;  %v2579_v30 = vld [vmem:[%s6333_s28 + $0x70] sm:$0xff] }
 0x2ab   : > { %5324 = vmatprep.subr.bf16.mxu1 %v5666_v42 }
 0x2ae   : > { %5326 = vmatpush3.bf16.msra.mxu1 %v6138_v39  ;;  %v2580_v39 = vld [vmem:[%s6333_s28 + $0x78] sm:$0xff]  ;;  %s6526_s28 = scalar_lea.vmem %s6798_s14, %s4115_s18  ;;  %s6588_s18 = scalar_lea.vmem %s6797_s13, %s6825_s25 }
 0x2af   : > { %5327 = vmatprep.subr.bf16.mxu1 %v5666_v42  ;;  %v2671_v47 = vld [vmem:[%s6526_s28 + $0x10] sm:$0xff]  ;;  %v2672_v48 = vld [vmem:[%s6526_s28 + $0x18] sm:$0xff]  ;;  %v2681_v35 = vld [vmem:[%s6526_s28 + $0x60] sm:$0xff] }
 0x2b0   : > { %v6535_v52 = vpack.c.bf16 %v2672_v48, %v2671_v47  ;;  %v2679_v12 = vld [vmem:[%s6526_s28 + $0x50] sm:$0xff]  ;;  %v2682_v37 = vld [vmem:[%s6526_s28 + $0x68] sm:$0xff]  ;;  %v2684_v51 = vld [vmem:[%s6526_s28 + $0x78] sm:$0xff] }
 0x2b1   : > { %v6572_v31 = vpack.c.bf16 %v2682_v37, %v2681_v35  ;;  %v2683_v50 = vld [vmem:[%s6526_s28 + $0x70] sm:$0xff]  ;;  %v2597_v3 = vld [vmem:[%s6588_s18] sm:$0x1]  ;;  %v4084_v37 = vld [vmem:[%s5972_s26 + $0x1b8] sm:$0xff] }
 0x2b2   : > { %5329 = vmatpush3.bf16.msra.mxu1 %v6147_v46  ;;  %v5244_v46 = vpack.c.bf16 %v2580_v39, %v2579_v30  ;;  %v2764_v30 = vld [vmem:[%s5972_s26 + $0x30] sm:$0xff]  ;;  %v2765_v39 = vld [vmem:[%s5972_s26 + $0x38] sm:$0xff]  ;;  %v4077_v48 = vld [vmem:[%s5972_s26 + $0x180] sm:$0xff] }
 0x2b3   : > { %5330 = vmatprep.subr.bf16.mxu1 %v5666_v42  ;;  %v4083_v35 = vld [vmem:[%s5972_s26 + $0x1b0] sm:$0xff] }
 0x2b4   : > { %5245 = vmatpush3.bf16.msra.mxu0 %v5244_v46 }
 0x2b5   : > { %5246 = vmatprep.subr.bf16.mxu0 %v5666_v42 }
 0x2b6   : > { %5332 = vmatpush3.bf16.msra.mxu1 %v6156_v53  ;;  %v2557_v53 = vsub.s32 1, %v6294_v32 }
 0x2b7   : > { %5333 = vmatprep.subr.bf16.mxu1 %v5666_v42 }
 0x2ba   : > { %5335 = vmatpush3.bf16.msra.mxu1 %v6165_v60 }
 0x2bb   : > { %5336 = vmatprep.subr.bf16.mxu1 %v5666_v42 }
 0x2be   : > { %5338 = vmatpush3.bf16.msra.mxu1 %v6174_v6 }
 0x2bf   : > { %5339 = vmatprep.subr.bf16.mxu1 %v5666_v42 }
 0x2c2   : > { %5341 = vmatpush3.bf16.msra.mxu1 %v6181_v11 }
 0x2c3   : > { %5366 = vmatprep.subr.bf16.mxu1 %v5666_v42 }
 0x2c5   : > { %4863 = vmatmul.mubr.f32.vlgmr.msra.gmra.mrb[12].mxu1 %v6108_v21 }
 0x2c6   : > { %5368 = vmatpush3.bf16.msra.mxu1 %v6187_v14  ;;  %4932 = vmatprep.mubr.msk.f32.mxu1 %vm5667_vm4, %v6817_v29 }
 0x2c7   : > { %5369 = vmatprep.subr.bf16.mxu1 %v5666_v42 }
 0x2ca   : > { %5371 = vmatpush3.bf16.msra.mxu1 %v6196_v18 }
 0x2cb   : > { %5372 = vmatprep.subr.bf16.mxu1 %v5666_v42 }
 0x2ce   : > { %5374 = vmatpush3.bf16.msra.mxu1 %v6204_v23  ;;  %v2669_v23 = vld [vmem:[%s6526_s28] sm:$0xff] }
 0x2cf   : > { %5375 = vmatprep.subr.bf16.mxu1 %v5666_v42 }
 0x2d2   : > { %5377 = vmatpush3.bf16.msra.mxu1 %v6210_v26  ;;  %v2670_v26 = vld [vmem:[%s6526_s28 + $0x8] sm:$0xff] }
 0x2d3   : > { %5378 = vmatprep.subr.bf16.mxu1 %v5666_v42 }
 0x2d6   : > { %5380 = vmatpush3.bf16.msra.mxu1 %v6216_v33 }
 0x2d7   : > { %5381 = vmatprep.subr.bf16.mxu1 %v5666_v42 }
 0x2da   : > { %5383 = vmatpush3.bf16.msra.mxu1 %v6222_v36 }
 0x2db   : > { %5384 = vmatprep.subr.bf16.mxu1 %v5666_v42 }
 0x2de   : > { %5386 = vmatpush3.bf16.msra.mxu1 %v6228_v41  ;;  %v6530_v41 = vpack.c.bf16 %v2670_v26, %v2669_v23  ;;  %v2770_v23 = vld [vmem:[%s5972_s26 + $0x60] sm:$0xff]  ;;  %v2771_v26 = vld [vmem:[%s5972_s26 + $0x68] sm:$0xff] }
 0x2df   : > { %5387 = vmatprep.subr.bf16.mxu1 %v5666_v42 }
 0x2e2   : > { %5389 = vmatpush3.bf16.msra.mxu1 %v6234_v45 }
 0x2e3   : > { %5455 = vmatprep.subr.bf16.mxu1 %v6345_v25  ;;  %v2673_v25 = vld [vmem:[%s6526_s28 + $0x20] sm:$0xff] }
 0x2e5   : > { %4933 = vmatmul.mubr.f32.vlgmr.msra.gmra.mrb[14].mxu1 %v6135_v38  ;;  %v2549_v38 = vld [vmem:[%s6515_s21] sm:$0x3] }
 0x2e6   : > { %5457 = vmatpush3.bf16.msra.mxu1 %v6350_v40  ;;  %v2554_v60 = vrot.slane %v2549_v38, %v6304_v44  ;;  %v2558_v6 = vrot.slane %v2549_v38, %v2557_v53  ;;  %v2674_v40 = vld [vmem:[%s6526_s28 + $0x28] sm:$0xff]  ;;  %v2766_v38 = vld [vmem:[%s5972_s26 + $0x40] sm:$0xff] }
 0x2e7   : > { %5459 = vmatprep.subr.bf16.mxu1 %v6352_v43  ;;  %v6543_v43 = vpack.c.bf16 %v2674_v40, %v2673_v25  ;;  %v4078_v25 = vld [vmem:[%s5972_s26 + $0x188] sm:$0xff]  ;;  %v2867_v40 = vrot.slane %v6108_v21, 6 }
 0x2ea   : > { %5461 = vmatpush3.bf16.msra.mxu1 %v6362_v58  ;;  %v2675_v58 = vld [vmem:[%s6526_s28 + $0x30] sm:$0xff] }
 0x2eb   : > { %5463 = vmatprep.subr.bf16.mxu1 %v6366_v1  ;;  %v2676_v1 = vld [vmem:[%s6526_s28 + $0x38] sm:$0xff] }
 0x2ee   : > { %5465 = vmatpush3.bf16.msra.mxu1 %v6376_v15  ;;  %v6549_v15 = vpack.c.bf16 %v2676_v1, %v2675_v58  ;;  %v2866_v58 = vrot.slane %v6095_v61, 6  ;;  %v5343_v1 = vpack.c.bf16 %v4078_v25, %v4077_v48  ;;  %v4081_v61 = vld [vmem:[%s5972_s26 + $0x1a0] sm:$0xff] }
 0x2ef   : > { %5467 = vmatprep.subr.bf16.mxu1 %v6380_v20  ;;  %v2677_v20 = vld [vmem:[%s6526_s28 + $0x40] sm:$0xff] }
 0x2f0   : > { %v3283_v25 = vld [vmem:[%s6246_s16 + $0x60] sm:$0xff] }
 0x2f2   : > { %5469 = vmatpush3.bf16.msra.mxu1 %v6390_v54  ;;  %v2678_v54 = vld [vmem:[%s6526_s28 + $0x48] sm:$0xff] }
 0x2f3   : > { %5471 = vmatprep.subr.bf16.mxu1 %v6394_v59  ;;  %v6555_v59 = vpack.c.bf16 %v2678_v54, %v2677_v20  ;;  %v4079_v20 = vld [vmem:[%s5972_s26 + $0x190] sm:$0xff]  ;;  %v4080_v54 = vld [vmem:[%s5972_s26 + $0x198] sm:$0xff] }
 0x2f6   : > { %5473 = vmatpush3.bf16.msra.mxu1 %v6404_v13  ;;  %v2680_v13 = vld [vmem:[%s6526_s28 + $0x58] sm:$0xff] }
 0x2f7   : > { %5475 = vmatprep.subr.bf16.mxu1 %v6408_v24  ;;  %v6561_v17 = vpack.c.bf16 %v2680_v13, %v2679_v12  ;;  %v2868_v12 = vsel %vm816_vm0, %v2866_v58, %v2867_v40  ;;  %v5346_v13 = vpack.c.bf16 %v4080_v54, %v4079_v20  ;;  %v3285_v40 = vld [vmem:[%s6246_s16 + $0x70] sm:$0xff]  ;;  %v3290_v20 = vld [vmem:[%s6246_s16 + $0x98] sm:$0xff] }
 0x2f8   : > { %v5404_v58 = vpack.c.bf16 %v3285_v40, %v3283_v25 }
 0x2fa   : > { %5477 = vmatpush3.bf16.msra.mxu1 %v6418_v55  ;;  %v6578_v55 = vpack.c.bf16 %v2684_v51, %v2683_v50  ;;  %v5352_v50 = vpack.c.bf16 %v4084_v37, %v4083_v35  ;;  %v4085_v51 = vld [vmem:[%s5972_s26 + $0x1c0] sm:$0xff] }
 0x2fb   : > { %5479 = vmatprep.subr.bf16.mxu1 %v6421_v63  ;;  %v3291_v37 = vld [vmem:[%s6246_s16 + $0xa0] sm:$0xff] }
 0x2fe   : > { %5481 = vmatpush3.bf16.msra.mxu1 %v5240_v16  ;;  %v5298_v16 = vpack.c.bf16 %v2761_v10, %v2760_v4  ;;  %v3043_v10 = vrot.slane %v6108_v21, 1  ;;  %v3280_v21 = vld [vmem:[%s6246_s16 + $0x48] sm:$0xff] }
 0x2ff   : > { %5483 = vmatprep.subr.bf16.mxu1 %v5242_v0  ;;  %v5301_v0 = vpack.c.bf16 %v2763_v28, %v2762_v22  ;;  %v3274_v22 = vld [vmem:[%s6246_s16 + $0x18] sm:$0xff]  ;;  %v3271_v28 = vld [vmem:[%s6246_s16] sm:$0xff] }
 0x302   : > { %5485 = vmatpush3.bf16.msra.mxu1 %v5244_v46  ;;  %v5304_v46 = vpack.c.bf16 %v2765_v39, %v2764_v30  ;;  %v3273_v30 = vld [vmem:[%s6246_s16 + $0x10] sm:$0xff]  ;;  %v3276_v39 = vld [vmem:[%s6246_s16 + $0x28] sm:$0xff] }
 0x303   : > { %5486 = vmatprep.subr.bf16.mxu1 %v5666_v42 }
 0x358   : > { %v2544_v11 = vpop.f32.mrb[8].mxu1 }
 0x359   : > { %v2561_v14 = vadd.f32 %v2554_v60, %v2544_v11  ;;  %v2546_v18 = vpop.f32.mrb[9].mxu1  ;;  %v2767_v60 = vld [vmem:[%s5972_s26 + $0x48] sm:$0xff]  ;;  %v2768_v11 = vld [vmem:[%s5972_s26 + $0x50] sm:$0xff] }
 0x35a   : > { %v2562_v33 = vadd.f32 %v2558_v6, %v2546_v18  ;;  %v5307_v6 = vpack.c.bf16 %v2767_v60, %v2766_v38  ;;  %v5392_v38 = vpack.c.bf16 %v3273_v30, %v3271_v28 }
 0x35b   : > { %v2563_v45 = vmax.f32 %v2561_v14, 0.0  ;;  %v2769_v14 = vld [vmem:[%s5972_s26 + $0x58] sm:$0xff] }
 0x35c   : > { %v2564_v36 = vmax.f32 %v2562_v33, 0.0  ;;  %v5310_v18 = vpack.c.bf16 %v2769_v14, %v2768_v11  ;;  %v5313_v33 = vpack.c.bf16 %v2771_v26, %v2770_v23  ;;  %v3277_v11 = vld [vmem:[%s6246_s16 + $0x30] sm:$0xff]  ;;  %v3282_v14 = vld [vmem:[%s6246_s16 + $0x58] sm:$0xff]  ;;  %v3279_v26 = vld [vmem:[%s6246_s16 + $0x40] sm:$0xff] }
 0x35d   : > { %v5398_v23 = vpack.c.bf16 %v3282_v14, %v3280_v21 }
 0x35e   : > { %2662 = vmatprep.mubr.f32.mxu0 %v2564_v36  ;;  %v2772_v36 = vld [vmem:[%s5972_s26 + $0x70] sm:$0xff] }
 0x35f   : > { %2663 = vmatmul.mubr.f32.vlgmr.msra.gmra.mrb[10].mxu0 %v2563_v45  ;;  %v2773_v45 = vld [vmem:[%s5972_s26 + $0x78] sm:$0xff] }
 0x360   : > { %5248 = vmatpush3.bf16.msra.mxu0 %v6530_v41  ;;  %4757 = vmatprep.mubr.msk.f32.mxu0 %vm5667_vm4, %v6817_v29  ;;  %v5316_v47 = vpack.c.bf16 %v2773_v45, %v2772_v36  ;;  %v3284_v36 = vld [vmem:[%s6246_s16 + $0x68] sm:$0xff]  ;;  %v3286_v45 = vld [vmem:[%s6246_s16 + $0x78] sm:$0xff] }
 0x361   : > { %5249 = vmatprep.subr.bf16.mxu0 %v5666_v42  ;;  %v5402_v48 = vpack.c.bf16 %v3286_v45, %v3284_v36  ;;  %v6701_v45 = vld [vmem:[%s6301_s30] sm:$0x1] }
 0x364   : > { %5251 = vmatpush3.bf16.msra.mxu0 %v6535_v52 }
 0x365   : > { %5252 = vmatprep.subr.bf16.mxu0 %v5666_v42 }
 0x368   : > { %5254 = vmatpush3.bf16.msra.mxu0 %v6543_v43 }
 0x369   : > { %5255 = vmatprep.subr.bf16.mxu0 %v5666_v42 }
 0x36c   : > { %5257 = vmatpush3.bf16.msra.mxu0 %v6549_v15 }
 0x36d   : > { %5258 = vmatprep.subr.bf16.mxu0 %v5666_v42 }
 0x370   : > { %5260 = vmatpush3.bf16.msra.mxu0 %v6555_v59 }
 0x371   : > { %5261 = vmatprep.subr.bf16.mxu0 %v5666_v42 }
 0x374   : > { %5263 = vmatpush3.bf16.msra.mxu0 %v6561_v17 }
 0x375   : > { %5264 = vmatprep.subr.bf16.mxu0 %v5666_v42 }
 0x378   : > { %v6566_v19 = vpop.f32.mrb[10].mxu1  ;;  %5266 = vmatpush3.bf16.msra.mxu0 %v6572_v31 }
 0x379   : > { %v4794_v24 = vpop.f32.mrb[11].mxu1  ;;  %5267 = vmatprep.subr.bf16.mxu0 %v5666_v42 }
 0x37a   : > { %v4082_v24 = vld [vmem:[%s5972_s26 + $0x1a8] sm:$0xff] }
 0x37c   : > { %5269 = vmatpush3.bf16.msra.mxu0 %v6578_v55 }
 0x37d   : > { %5294 = vmatprep.subr.bf16.mxu0 %v5666_v42 }
 0x398   : > { %v6568_v27 = vpop.f32.mrb[12].mxu1 }
 0x399   : > { %v4864_v34 = vpop.f32.mrb[13].mxu1 }
 0x39a   : > { %v5349_v34 = vpack.c.bf16 %v4082_v24, %v4081_v61  ;;  %v3292_v24 = vld [vmem:[%s6246_s16 + $0xa8] sm:$0xff] }
 0x3b8   : > { %v6582_v57 = vpop.f32.mrb[14].mxu1 }
 0x3b9   : > { %v4934_v63 = vpop.f32.mrb[15].mxu1 }
 0x3ba   : > { %v4086_v63 = vld [vmem:[%s5972_s26 + $0x1c8] sm:$0xff] }
 0x432   : > { %v4293_v2 = vpop.f32.mrb[10].mxu0 }
 0x433   : > { %v4294_v5 = vpop.f32.mrb[11].mxu0 }
 0x434   : > { %v4295_v7 = vadd.f32 %v4294_v5, %v4293_v2  ;;  %v5355_v2 = vpack.c.bf16 %v4086_v63, %v4085_v51  ;;  %v4088_v5 = vld [vmem:[%s5972_s26 + $0x1d8] sm:$0xff]  ;;  %v3296_v63 = vld [vmem:[%s6246_s16 + $0xc8] sm:$0xff] }
 0x436   : > { %v2665_v49 = vadd.f32 %v4295_v7, %v2597_v3  ;;  %v4087_v3 = vld [vmem:[%s5972_s26 + $0x1d0] sm:$0xff] }
 0x437   : > { %v5358_v7 = vpack.c.bf16 %v4088_v5, %v4087_v3  ;;  %v3295_v5 = vld [vmem:[%s6246_s16 + $0xc0] sm:$0xff] }
 0x438   : > { %v2668_v62 = vmax.f32 %v2665_v49, 0.0  ;;  %v5361_v49 = vpack.c.bf16 %v4090_v9, %v4089_v8  ;;  %v3300_v9 = vld [vmem:[%s6246_s16 + $0xe8] sm:$0xff] }
 0x43a   : > { %4758 = vmatmul.mubr.f32.vlgmr.msra.gmra.mrb[12].mxu0 %v2668_v62  ;;  %v4092_v62 = vld [vmem:[%s5972_s26 + $0x1f8] sm:$0xff] }
 0x43b   : > { %5296 = vmatpush3.bf16.msra.mxu0 %v5295_v56  ;;  %4827 = vmatprep.mubr.msk.f32.mxu0 %vm5667_vm4, %v6817_v29  ;;  %v4091_v56 = vld [vmem:[%s5972_s26 + $0x1f0] sm:$0xff] }
 0x43c   : > { %5297 = vmatprep.subr.bf16.mxu0 %v5666_v42  ;;  %v5364_v4 = vpack.c.bf16 %v4092_v62, %v4091_v56  ;;  %v3299_v62 = vld [vmem:[%s6246_s16 + $0xe0] sm:$0xff] }
 0x43f   : > { %5299 = vmatpush3.bf16.msra.mxu0 %v5298_v16  ;;  %v3272_v16 = vld [vmem:[%s6246_s16 + $0x8] sm:$0xff] }
 0x440   : > { %5300 = vmatprep.subr.bf16.mxu0 %v5666_v42 }
 0x443   : > { %5302 = vmatpush3.bf16.msra.mxu0 %v5301_v0  ;;  %v5390_v0 = vpack.c.bf16 %v3274_v22, %v3272_v16  ;;  %v3240_v16 = vld [vmem:[%s6280_s17 + $0x8] sm:$0xff]  ;;  %v3242_v22 = vld [vmem:[%s6280_s17 + $0x18] sm:$0xff] }
 0x444   : > { %5303 = vmatprep.subr.bf16.mxu0 %v5666_v42  ;;  %v5422_v28 = vpack.c.bf16 %v3242_v22, %v3240_v16  ;;  %v3255_v22 = vld [vmem:[%s6280_s17 + $0x80] sm:$0xff] }
 0x447   : > { %5305 = vmatpush3.bf16.msra.mxu0 %v5304_v46  ;;  %v3278_v46 = vld [vmem:[%s6246_s16 + $0x38] sm:$0xff] }
 0x448   : > { %5306 = vmatprep.subr.bf16.mxu0 %v5666_v42  ;;  %v5394_v60 = vpack.c.bf16 %v3278_v46, %v3276_v39 }
 0x44b   : > { %5308 = vmatpush3.bf16.msra.mxu0 %v5307_v6  ;;  %v3275_v6 = vld [vmem:[%s6246_s16 + $0x20] sm:$0xff] }
 0x44c   : > { %5309 = vmatprep.subr.bf16.mxu0 %v5666_v42 }
 0x44f   : > { %5311 = vmatpush3.bf16.msra.mxu0 %v5310_v18  ;;  %v5396_v18 = vpack.c.bf16 %v3277_v11, %v3275_v6 }
 0x450   : > { %5312 = vmatprep.subr.bf16.mxu0 %v5666_v42 }
 0x453   : > { %5314 = vmatpush3.bf16.msra.mxu0 %v5313_v33  ;;  %v3281_v33 = vld [vmem:[%s6246_s16 + $0x50] sm:$0xff] }
 0x454   : > { %5315 = vmatprep.subr.bf16.mxu0 %v5666_v42 }
 0x457   : > { %5317 = vmatpush3.bf16.msra.mxu0 %v5316_v47  ;;  %v5400_v47 = vpack.c.bf16 %v3281_v33, %v3279_v26  ;;  %v4109_v26 = vld [vmem:[%s6292_s23] ss:$0 sm:$0xff] }
 0x458   : > { %5342 = vmatprep.subr.bf16.mxu0 %v5666_v42 }
 0x45a   : > { %4828 = vmatmul.mubr.f32.vlgmr.msra.gmra.mrb[14].mxu0 %v2868_v12  ;;  %v3287_v12 = vld [vmem:[%s6246_s16 + $0x80] sm:$0xff] }
 0x45b   : > { %5344 = vmatpush3.bf16.msra.mxu0 %v5343_v1  ;;  %4897 = vmatprep.mubr.msk.f32.mxu0 %vm5667_vm4, %v6817_v29  ;;  %v3288_v1 = vld [vmem:[%s6246_s16 + $0x88] sm:$0xff] }
 0x45c   : > { %5345 = vmatprep.subr.bf16.mxu0 %v5666_v42  ;;  %v5406_v54 = vpack.c.bf16 %v3290_v20, %v3288_v1  ;;  %v3241_v1 = vld [vmem:[%s6280_s17 + $0x10] sm:$0xff]  ;;  %v3244_v20 = vld [vmem:[%s6280_s17 + $0x28] sm:$0xff] }
 0x45f   : > { %5347 = vmatpush3.bf16.msra.mxu0 %v5346_v13  ;;  %v3289_v13 = vld [vmem:[%s6246_s16 + $0x90] sm:$0xff] }
 0x460   : > { %5348 = vmatprep.subr.bf16.mxu0 %v5666_v42  ;;  %v5408_v61 = vpack.c.bf16 %v3289_v13, %v3287_v12 }
 0x463   : > { %5350 = vmatpush3.bf16.msra.mxu0 %v5349_v34  ;;  %v3294_v34 = vld [vmem:[%s6246_s16 + $0xb8] sm:$0xff] }
 0x464   : > { %5351 = vmatprep.subr.bf16.mxu0 %v5666_v42  ;;  %v5410_v35 = vpack.c.bf16 %v3294_v34, %v3292_v24  ;;  %v3243_v34 = vld [vmem:[%s6280_s17 + $0x20] sm:$0xff] }
 0x467   : > { %5353 = vmatpush3.bf16.msra.mxu0 %v5352_v50  ;;  %v3293_v50 = vld [vmem:[%s6246_s16 + $0xb0] sm:$0xff] }
 0x468   : > { %5354 = vmatprep.subr.bf16.mxu0 %v5666_v42  ;;  %v5412_v51 = vpack.c.bf16 %v3293_v50, %v3291_v37  ;;  %v3248_v37 = vld [vmem:[%s6280_s17 + $0x48] sm:$0xff]  ;;  %v3250_v50 = vld [vmem:[%s6280_s17 + $0x58] sm:$0xff] }
 0x46b   : > { %5356 = vmatpush3.bf16.msra.mxu0 %v5355_v2  ;;  %v3298_v2 = vld [vmem:[%s6246_s16 + $0xd8] sm:$0xff] }
 0x46c   : > { %5357 = vmatprep.subr.bf16.mxu0 %v5666_v42  ;;  %v5414_v3 = vpack.c.bf16 %v3298_v2, %v3296_v63  ;;  %v5430_v63 = vpack.c.bf16 %v3250_v50, %v3248_v37  ;;  %v3247_v2 = vld [vmem:[%s6280_s17 + $0x40] sm:$0xff] }
 0x46f   : > { %5359 = vmatpush3.bf16.msra.mxu0 %v5358_v7  ;;  %v3297_v7 = vld [vmem:[%s6246_s16 + $0xd0] sm:$0xff] }
 0x470   : > { %5360 = vmatprep.subr.bf16.mxu0 %v5666_v42  ;;  %v5416_v8 = vpack.c.bf16 %v3297_v7, %v3295_v5  ;;  %v3252_v5 = vld [vmem:[%s6280_s17 + $0x68] sm:$0xff]  ;;  %v3254_v7 = vld [vmem:[%s6280_s17 + $0x78] sm:$0xff] }
 0x473   : > { %5362 = vmatpush3.bf16.msra.mxu0 %v5361_v49  ;;  %v3302_v49 = vld [vmem:[%s6246_s16 + $0xf8] sm:$0xff] }
 0x474   : > { %5363 = vmatprep.subr.bf16.mxu0 %v5666_v42  ;;  %v5418_v56 = vpack.c.bf16 %v3302_v49, %v3300_v9  ;;  %v5434_v9 = vpack.c.bf16 %v3254_v7, %v3252_v5  ;;  %v3251_v49 = vld [vmem:[%s6280_s17 + $0x60] sm:$0xff] }
 0x477   : > { %5365 = vmatpush3.bf16.msra.mxu0 %v5364_v4  ;;  %v3301_v4 = vld [vmem:[%s6246_s16 + $0xf0] sm:$0xff] }
 0x478   : > { %5391 = vmatprep.subr.bf16.mxu0 %v5390_v0  ;;  %v2685_v0 = vld [vmem:[%s6685_s0] sm:$0x1] }
 0x47a   : > { %4898 = vmatmul.mubr.f32.vlgmr.msra.gmra.mrb[16].mxu0 %v3043_v10  ;;  %v5420_v10 = vpack.c.bf16 %v3301_v4, %v3299_v62  ;;  %v3256_v62 = vld [vmem:[%s6280_s17 + $0x88] sm:$0xff]  ;;  %v3258_v4 = vld [vmem:[%s6280_s17 + $0x98] sm:$0xff] }
 0x47b   : > { %3370 = vmatprep.mubr.f32.mxu0 %v6817_v29  ;;  %5393 = vmatpush1.bf16.msra.mxu0 %v5392_v38  ;;  %v5438_v16 = vpack.c.bf16 %v3258_v4, %v3256_v62 }
 0x47c   : > { %5395 = vmatprep.subr.bf16.mxu0 %v5394_v60 }
 0x47f   : > { %5397 = vmatpush1.bf16.msra.mxu0 %v5396_v18 }
 0x480   : > { %5399 = vmatprep.subr.bf16.mxu0 %v5398_v23 }
 0x483   : > { %5401 = vmatpush1.bf16.msra.mxu0 %v5400_v47 }
 0x484   : > { %5403 = vmatprep.subr.bf16.mxu0 %v5402_v48 }
 0x487   : > { %5405 = vmatpush1.bf16.msra.mxu0 %v5404_v58  ;;  %v3239_v58 = vld [vmem:[%s6280_s17] sm:$0xff] }
 0x488   : > { %5407 = vmatprep.subr.bf16.mxu0 %v5406_v54  ;;  %v3246_v54 = vld [vmem:[%s6280_s17 + $0x38] sm:$0xff]  ;;  %v5424_v13 = vpack.c.bf16 %v3241_v1, %v3239_v58  ;;  %v3448_v1 = vld [vmem:[%s6515_s21] sm:$0x3] }
 0x489   : > { %v5426_v24 = vpack.c.bf16 %v3246_v54, %v3244_v20  ;;  %v3453_v20 = vrot.slane %v3448_v1, %v6304_v44  ;;  %v3457_v54 = vrot.slane %v3448_v1, %v2557_v53 }
 0x48b   : > { %5409 = vmatpush1.bf16.msra.mxu0 %v5408_v61 }
 0x48c   : > { %5411 = vmatprep.subr.bf16.mxu0 %v5410_v35  ;;  %v3245_v35 = vld [vmem:[%s6280_s17 + $0x30] sm:$0xff] }
 0x48f   : > { %5413 = vmatpush1.bf16.msra.mxu0 %v5412_v51  ;;  %v5428_v51 = vpack.c.bf16 %v3245_v35, %v3243_v34 }
 0x490   : > { %5415 = vmatprep.subr.bf16.mxu0 %v5414_v3  ;;  %v3249_v3 = vld [vmem:[%s6280_s17 + $0x50] sm:$0xff] }
 0x493   : > { %5417 = vmatpush1.bf16.msra.mxu0 %v5416_v8  ;;  %v5432_v8 = vpack.c.bf16 %v3249_v3, %v3247_v2 }
 0x494   : > { %5419 = vmatprep.subr.bf16.mxu0 %v5418_v56  ;;  %v3253_v56 = vld [vmem:[%s6280_s17 + $0x70] sm:$0xff] }
 0x497   : > { %5421 = vmatpush1.bf16.msra.mxu0 %v5420_v10  ;;  %v5436_v10 = vpack.c.bf16 %v3253_v56, %v3251_v49 }
 0x498   : > { %5423 = vmatprep.subr.bf16.mxu0 %v5422_v28  ;;  %v3257_v28 = vld [vmem:[%s6280_s17 + $0x90] sm:$0xff] }
 0x50d   : > { %v2752_v30 = vpop.f32.mrb[12].mxu0 }
 0x50e   : > { %v2753_v39 = vadd.f32 %v2752_v30, %v2685_v0  ;;  %v4759_v46 = vpop.f32.mrb[13].mxu0  ;;  %v3260_v0 = vld [vmem:[%s6280_s17 + $0xa8] sm:$0xff]  ;;  %v3262_v30 = vld [vmem:[%s6280_s17 + $0xb8] sm:$0xff] }
 0x50f   : > { %v5442_v46 = vpack.c.bf16 %v3262_v30, %v3260_v0 }
 0x510   : > { %v2756_v38 = vmax.f32 %v2753_v39, 0.0  ;;  %v5440_v39 = vpack.c.bf16 %v3257_v28, %v3255_v22 }
 0x512   : > { %2757 = vst [vmem:[%s6693_s29] sm:$0x1] %v2756_v38  ;;  %v3259_v38 = vld [vmem:[%s6280_s17 + $0xa0] sm:$0xff] }
 0x52d   : > { %v2936_v60 = vpop.f32.mrb[14].mxu0 }
 0x52e   : > { %v2937_v6 = vadd.f32 %v2936_v60, %v6566_v19  ;;  %v4829_v11 = vpop.f32.mrb[15].mxu0  ;;  %v6704_v19 = vld [vmem:[%s6310_s20] sm:$0x1]  ;;  %v3261_v60 = vld [vmem:[%s6280_s17 + $0xb0] sm:$0xff] }
 0x52f   : > { %v3236_v40 = vrot.slane %v6704_v19, %v6304_v44  ;;  %v3266_v11 = vld [vmem:[%s6280_s17 + $0xd8] sm:$0xff] }
 0x530   : > { %v3026_v21 = vadd.f32 %v6568_v27, %v2937_v6  ;;  %v3229_v27 = vrot.slane %v6701_v45, %v6304_v44  ;;  %v3264_v6 = vld [vmem:[%s6280_s17 + $0xc8] sm:$0xff]  ;;  %v3496_v44 = vld [vmem:[%s6588_s18] sm:$0x1] }
 0x54d   : > { %v3111_v14 = vpop.f32.mrb[16].mxu0 }
 0x54e   : > { %v3115_v18 = vadd.f32 %v3111_v14, %v3026_v21  ;;  %v4899_v23 = vpop.f32.mrb[17].mxu0  ;;  %v5444_v21 = vpack.c.bf16 %v3261_v60, %v3259_v38  ;;  %v5446_v14 = vpack.c.bf16 %v3266_v11, %v3264_v6 }
 0x54f   : > { %v3265_v23 = vld [vmem:[%s6280_s17 + $0xd0] sm:$0xff] }
 0x550   : > { %v3207_v33 = vadd.f32 %v6582_v57, %v3115_v18  ;;  %v3263_v18 = vld [vmem:[%s6280_s17 + $0xc0] sm:$0xff] }
 0x552   : > { %v3215_v36 = vadd.f32 %v4109_v26, %v3207_v33  ;;  %v3268_v26 = vld [vmem:[%s6280_s17 + $0xe8] sm:$0xff]  ;;  %v3270_v33 = vld [vmem:[%s6280_s17 + $0xf8] sm:$0xff] }
 0x554   : > { %v3216_v47 = vmax.f32 %v3215_v36, 0.0  ;;  %v5448_v36 = vpack.c.bf16 %v3265_v23, %v3263_v18 }
 0x556   : > { %v3218_v48 = vrot.slane %v3216_v47, 2 }
 0x558   : > { %v6708_v25 = vmax.f32 %v3216_v47, %v3218_v48  ;;  %v5450_v47 = vpack.c.bf16 %v3270_v33, %v3268_v26  ;;  %v3267_v48 = vld [vmem:[%s6280_s17 + $0xe0] sm:$0xff] }
 0x55a   : > { %v3231_v57 = vmul.f32 %v3229_v27, %v6708_v25  ;;  %v3269_v27 = vld [vmem:[%s6280_s17 + $0xf0] sm:$0xff] }
 0x55c   : > { %v3238_v12 = vadd.f32 %v3236_v40, %v3231_v57  ;;  %v5452_v40 = vpack.c.bf16 %v3269_v27, %v3267_v48  ;;  %v3222_v57 = vmul.f32 %v6701_v45, %v6708_v25 }
 0x55e   : > { %v3304_v61 = vrot.slane %v3238_v12, 4  ;;  %v3224_v58 = vadd.f32 %v6704_v19, %v3222_v57 }
 0x560   : > { %3371 = vmatmul.mubr.f32.vlgmr.msra.gmra.mrb[18].mxu0 %v3304_v61 }
 0x561   : > { %5425 = vmatpush1.bf16.msra.mxu0 %v5424_v13  ;;  %3441 = vmatprep.mubr.f32.mxu0 %v6817_v29 }
 0x562   : > { %5427 = vmatprep.subr.bf16.mxu0 %v5426_v24 }
 0x565   : > { %5429 = vmatpush1.bf16.msra.mxu0 %v5428_v51 }
 0x566   : > { %5431 = vmatprep.subr.bf16.mxu0 %v5430_v63 }
 0x569   : > { %5433 = vmatpush1.bf16.msra.mxu0 %v5432_v8 }
 0x56a   : > { %5435 = vmatprep.subr.bf16.mxu0 %v5434_v9 }
 0x56d   : > { %5437 = vmatpush1.bf16.msra.mxu0 %v5436_v10 }
 0x56e   : > { %5439 = vmatprep.subr.bf16.mxu0 %v5438_v16 }
 0x571   : > { %5441 = vmatpush1.bf16.msra.mxu0 %v5440_v39 }
 0x572   : > { %5443 = vmatprep.subr.bf16.mxu0 %v5442_v46 }
 0x575   : > { %5445 = vmatpush1.bf16.msra.mxu0 %v5444_v21 }
 0x576   : > { %5447 = vmatprep.subr.bf16.mxu0 %v5446_v14 }
 0x579   : > { %5449 = vmatpush1.bf16.msra.mxu0 %v5448_v36 }
 0x57a   : > { %5451 = vmatprep.subr.bf16.mxu0 %v5450_v47 }
 0x57d   : > { %5453 = vmatpush1.bf16.msra.mxu0 %v5452_v40 }
 0x580   : > { %3442 = vmatmul.mubr.f32.vlgmr.msra.gmra.mrb[18].mxu0 %v3224_v58 }
 0x653   : > { %v3443_v12 = vpop.f32.mrb[18].mxu0 }
 0x654   : > { %v3460_v13 = vadd.f32 %v3453_v20, %v3443_v12  ;;  %v3445_v61 = vpop.f32.mrb[19].mxu0 }
 0x655   : > { %v3461_v24 = vadd.f32 %v3457_v54, %v3445_v61 }
 0x656   : > { %v3462_v35 = vmax.f32 %v3460_v13, 0.0 }
 0x657   : > { %v3463_v34 = vmax.f32 %v3461_v24, 0.0 }
 0x659   : > { %3561 = vmatprep.mubr.f32.mxu1 %v3463_v34 }
 0x65a   : > { %3562 = vmatmul.mubr.f32.vlgmr.msra.gmra.mrb[16].mxu1 %v3462_v35 }
 0x65b   : > { %5488 = vmatpush3.bf16.msra.mxu1 %v6530_v41  ;;  %4967 = vmatprep.mubr.msk.f32.mxu1 %vm5667_vm4, %v6817_v29 }
 0x65c   : > { %5489 = vmatprep.subr.bf16.mxu1 %v5666_v42 }
 0x65f   : > { %5491 = vmatpush3.bf16.msra.mxu1 %v6535_v52 }
 0x660   : > { %5492 = vmatprep.subr.bf16.mxu1 %v5666_v42 }
 0x663   : > { %5494 = vmatpush3.bf16.msra.mxu1 %v6543_v43  ;;  %v3584_v43 = vld [vmem:[%s6685_s0] sm:$0x1] }
 0x664   : > { %5495 = vmatprep.subr.bf16.mxu1 %v5666_v42 }
 0x667   : > { %5497 = vmatpush3.bf16.msra.mxu1 %v6549_v15 }
 0x668   : > { %5498 = vmatprep.subr.bf16.mxu1 %v5666_v42 }
 0x66b   : > { %5500 = vmatpush3.bf16.msra.mxu1 %v6555_v59 }
 0x66c   : > { %5501 = vmatprep.subr.bf16.mxu1 %v5666_v42 }
 0x66f   : > { %5503 = vmatpush3.bf16.msra.mxu1 %v6561_v17 }
 0x670   : > { %5504 = vmatprep.subr.bf16.mxu1 %v5666_v42 }
 0x673   : > { %5506 = vmatpush3.bf16.msra.mxu1 %v6572_v31 }
 0x674   : > { %5507 = vmatprep.subr.bf16.mxu1 %v5666_v42 }
 0x677   : > { %5509 = vmatpush3.bf16.msra.mxu1 %v6578_v55 }
 0x72d   : > { %v4430_v32 = vpop.f32.mrb[16].mxu1 }
 0x72e   : > { %v4431_v29 = vpop.f32.mrb[17].mxu1 }
 0x72f   : > { %v4432_v53 = vadd.f32 %v4431_v29, %v4430_v32 }
 0x731   : > { %v3564_v41 = vadd.f32 %v4432_v53, %v3496_v44 }
 0x733   : > { %v3567_v52 = vmax.f32 %v3564_v41, 0.0 }
 0x735   : > { %4968 = vmatmul.mubr.f32.vlgmr.msra.gmra.mrb[18].mxu1 %v3567_v52 }
 0x808   : > { %v3651_v15 = vpop.f32.mrb[18].mxu1 }
 0x809   : > { %v3652_v59 = vadd.f32 %v3651_v15, %v3584_v43  ;;  %v4969_v17 = vpop.f32.mrb[19].mxu1 }
 0x80b   : > { %v3655_v45 = vmax.f32 %v3652_v59, 0.0 }
 0x80d   : > { %3656 = vst [vmem:[%s6693_s29 + $0x1] sm:$0x1] %v3655_v45 }
 0x80e PF: > { %s6819_s24 = sld [smem:[#allocation6_spill]]  ;;  %s6820_s25 = sld [smem:[#allocation5_spill]] }
 0x80f   : > { %s6821_s23 = sld [smem:[#allocation7_spill]]  ;;  %s6822_s21 = smov %s5652_s22 }
 0x814   : > { %p26_p7 = scmp.ge.s32.totalorder %s6819_s24, 6   ;;  %s6823_s22 = smov %s6820_s25 }
 0x816   :  { %28 = sbr.rel (!%p26_p7) target bundleno = 6 (0x6), region = 183 }
 0x81d   :  { %3676 = vsyncpa [#allocation3], 1 }
 0x81e   :  { %3678 = vsyncpa [#allocation3 + $0x1], 1 }

</bundles_post_ra>
